<compile_context>
chip_gen: v7x
topology: tpu7x:2x2x1
jax: 0.10.0
libtpu: 0.0.40
codegen_flags: <defaults>
</compile_context>

<pallas_src>
import functools
import math

import jax
import jax.numpy as jnp
from jax.experimental import pallas as pl
from jax.experimental.pallas import tpu as pltpu


def _round_up(x, m):
    return ((x + m - 1) // m) * m


def _dqn_fused_kernel(*refs, layer_plan, num_weight_arrays):
    """Fused MLP: chained Linear(+ReLU) layers, everything resident in VMEM.

    refs = [x (bf16, [TB, IN_pad]),
            w_0..w_{G-1} (bf16, lane-concatenated per input-width group),
            b_packed (f32, [1, sum(out_pad)]),
            out (f32, [TB, OUT_pad])]
    layer_plan[i] = (group_idx, col_offset, bias_offset, out_dim, relu)
    — all entries are static Python ints / bools.
    """
    x_ref = refs[0]
    w_refs = refs[1:1 + num_weight_arrays]
    b_ref = refs[1 + num_weight_arrays]
    o_ref = refs[2 + num_weight_arrays]

    h = x_ref[...]                                            # bf16 [TB, IN_pad]
    for (wi, col, boff, out_dim, relu) in layer_plan:
        w = w_refs[wi][:, col:col + out_dim]                  # static, 128-aligned slice
        b = b_ref[:, boff:boff + out_dim]                     # f32 [1, out_dim]
        y = jnp.dot(h, w, preferred_element_type=jnp.float32) + b
        if relu:
            h = jnp.maximum(y, 0.0).astype(jnp.bfloat16)      # keep activations bf16
        else:
            h = y                                             # final layer stays f32
    o_ref[...] = h.astype(o_ref.dtype)


def dqn_forward_pallas(x, weight_arrays, layer_plan, bias_packed, action_size,
                       *, batch_tile=128):
    """One pallas_call; grid over batch chunks, weights fetched once & resident."""
    B = x.shape[0]
    IN_pad = weight_arrays[0].shape[0]
    OUT_pad = layer_plan[-1][3]

    # Pad batch to the bf16 sublane tile; choose a batch chunk and pad to it.
    B_pad = _round_up(max(B, 16), 16)
    TB = batch_tile if B_pad >= batch_tile else B_pad
    B_pad = _round_up(B_pad, TB)
    grid = (B_pad // TB,)

    # Zero-padded bf16 input (padding rows/cols are inert and sliced off below).
    x_pad = jnp.zeros((B_pad, IN_pad), jnp.bfloat16)
    x_pad = x_pad.at[:B, :x.shape[1]].set(x.astype(jnp.bfloat16))

    num_w = len(weight_arrays)
    kernel = functools.partial(
        _dqn_fused_kernel,
        layer_plan=tuple(layer_plan),
        num_weight_arrays=num_w,
    )

    in_specs = [pl.BlockSpec((TB, IN_pad), lambda i: (i, 0))]
    # Constant index maps: each weight/bias block is identical across grid
    # steps, so Pallas keeps it resident in VMEM (one DMA per call).
    for w in weight_arrays:
        in_specs.append(pl.BlockSpec(w.shape, lambda i: (0, 0)))
    in_specs.append(pl.BlockSpec(bias_packed.shape, lambda i: (0, 0)))

    out = pl.pallas_call(
        kernel,
        out_shape=jax.ShapeDtypeStruct((B_pad, OUT_pad), jnp.float32),
        grid=grid,
        in_specs=in_specs,
        out_specs=pl.BlockSpec((TB, OUT_pad), lambda i: (i, 0)),
        compiler_params=pltpu.CompilerParams(
            dimension_semantics=("parallel",),
            vmem_limit_bytes=32 * 1024 * 1024,
        ),
    )(x_pad, *weight_arrays, bias_packed)

    return out[:B, :action_size]


class DQNPallas:
    """Mirrors the PyTorch DQN module: fc1..fc10, ReLU after fc1..fc9."""

    LAYER_SIZES = [1024, 512, 512, 256, 256, 128, 128, 128, 128]

    def __init__(self, input_size, action_size, key):
        self.input_size = input_size
        self.action_size = action_size
        dims = [input_size] + self.LAYER_SIZES + [action_size]
        n = len(dims) - 1

        # Contraction (K) dims: only pad to the bf16 sublane tile (16); the
        # hidden sizes are already multiples of 128 so only fc1's K is small.
        # Output (N) dims: pad to 128 so every result / bias slice is lane-dense.
        in_dims = [_round_up(input_size, 16)] + [_round_up(d, 128) for d in dims[1:-1]]
        out_dims = [_round_up(d, 128) for d in dims[1:]]

        # Deterministic init matching nn.Linear uniform(-1/sqrt(fan_in), 1/sqrt(fan_in)).
        w_pads, b_pads = [], []
        for li in range(n):
            fan_in, fan_out = dims[li], dims[li + 1]
            pin, pout = in_dims[li], out_dims[li]
            key, wk, bk = jax.random.split(key, 3)
            bound = 1.0 / math.sqrt(fan_in)
            w = jax.random.uniform(wk, (fan_in, fan_out), jnp.float32, -bound, bound)
            b = jax.random.uniform(bk, (fan_out,), jnp.float32, -bound, bound)
            w_pads.append(jnp.zeros((pin, pout), jnp.float32).at[:fan_in, :fan_out].set(w))
            b_pads.append(jnp.zeros((pout,), jnp.float32).at[:fan_out].set(b))

        # Bias offsets (all multiples of 128 -> lane-aligned in-kernel slices).
        bias_offsets = []
        off = 0
        for li in range(n):
            bias_offsets.append(off)
            off += out_dims[li]
        self.bias_packed = jnp.concatenate(b_pads).reshape(1, -1)

        # Pack consecutive layers sharing the same padded input width into one
        # lane-concatenated bf16 array (fewer, larger weight DMAs).
        packed_weights = []
        layer_plan = []
        li = 0
        while li < n:
            group = [li]
            while li + len(group) < n and in_dims[li + len(group)] == in_dims[li]:
                group.append(li + len(group))
            col = 0
            for lj in group:
                layer_plan.append((len(packed_weights), col, bias_offsets[lj],
                                   out_dims[lj], lj < n - 1))
                col += out_dims[lj]
            packed_weights.append(
                jnp.concatenate([w_pads[lj] for lj in group], axis=1).astype(jnp.bfloat16))
            li += len(group)

        self.weights = packed_weights
        self.layer_plan = tuple(layer_plan)

    def __call__(self, x):
        return dqn_forward_pallas(x, self.weights, self.layer_plan,
                                  self.bias_packed, self.action_size)


def reference_forward(model, x):
    """Plain-JAX reference using the exact same packed bf16 parameters/dtypes."""
    B = x.shape[0]
    IN_pad = model.weights[model.layer_plan[0][0]].shape[0]
    h = jnp.zeros((B, IN_pad), jnp.bfloat16).at[:, :x.shape[1]].set(x.astype(jnp.bfloat16))
    for (wi, col, boff, out_dim, relu) in model.layer_plan:
        w = model.weights[wi][:, col:col + out_dim]
        b = model.bias_packed[:, boff:boff + out_dim]
        y = jnp.dot(h, w, preferred_element_type=jnp.float32) + b
        if relu:
            h = jnp.maximum(y, 0.0).astype(jnp.bfloat16)
        else:
            h = y
    return h[:, :model.action_size]


if __name__ == "__main__":
    key = jax.random.PRNGKey(0)
    batch = 2
    input_size = 32
    action_size = 8

    key, xk, mk = jax.random.split(key, 3)
    x = jax.random.normal(xk, (batch, input_size), jnp.float32)

    model = DQNPallas(input_size, action_size, mk)

    out = model(x)
    out = jax.block_until_ready(out)

    ref = reference_forward(model, x)
    assert out.shape == (batch, action_size)
    assert jnp.allclose(out, ref, atol=1e-2, rtol=1e-2), "mismatch vs reference"

    print("KERNEL_OK")
</pallas_src>

<mosaic_0001>
module attributes {stable_mosaic.version = 11 : i64} {
  func.func @_dqn_fused_kernel(%arg0: i32, %arg1: memref<16x32xbf16, #tpu.memory_space<vmem>>, %arg2: memref<32x1024xbf16, #tpu.memory_space<vmem>>, %arg3: memref<1024x512xbf16, #tpu.memory_space<vmem>>, %arg4: memref<512x768xbf16, #tpu.memory_space<vmem>>, %arg5: memref<256x384xbf16, #tpu.memory_space<vmem>>, %arg6: memref<128x512xbf16, #tpu.memory_space<vmem>>, %arg7: memref<1x3200xf32, #tpu.memory_space<vmem>>, %arg8: memref<16x128xf32, #tpu.memory_space<vmem>>) attributes {dimension_semantics = [#tpu.dimension_semantics<parallel>], iteration_bounds = array<i64: 1>, scalar_prefetch = 0 : i64, scratch_operands = 0 : i64, tpu.core_type = #tpu.core_type<tc>, window_params = [{transform_indices = @transform_0, window_bounds = array<i64: 16, 32>}, {pipeline_mode = #tpu.pipeline_mode<synchronous>, transform_indices = @transform_1, window_bounds = array<i64: 32, 1024>}, {pipeline_mode = #tpu.pipeline_mode<synchronous>, transform_indices = @transform_2, window_bounds = array<i64: 1024, 512>}, {pipeline_mode = #tpu.pipeline_mode<synchronous>, transform_indices = @transform_3, window_bounds = array<i64: 512, 768>}, {pipeline_mode = #tpu.pipeline_mode<synchronous>, transform_indices = @transform_4, window_bounds = array<i64: 256, 384>}, {pipeline_mode = #tpu.pipeline_mode<synchronous>, transform_indices = @transform_5, window_bounds = array<i64: 128, 512>}, {pipeline_mode = #tpu.pipeline_mode<synchronous>, transform_indices = @transform_6, window_bounds = array<i64: 1, 3200>}, {transform_indices = @transform_7, window_bounds = array<i64: 16, 128>}]} {
    %c0 = arith.constant 0 : index
    %c0_0 = arith.constant 0 : index
    %0 = vector.load %arg1[%c0, %c0_0] : memref<16x32xbf16, #tpu.memory_space<vmem>>, vector<16x32xbf16>
    %c0_1 = arith.constant 0 : index
    %c0_2 = arith.constant 0 : index
    %1 = vector.load %arg2[%c0_1, %c0_2] : memref<32x1024xbf16, #tpu.memory_space<vmem>>, vector<32x1024xbf16>
    %c0_3 = arith.constant 0 : index
    %c0_4 = arith.constant 0 : index
    %2 = vector.load %arg7[%c0_3, %c0_4] : memref<1x3200xf32, #tpu.memory_space<vmem>>, vector<1x1024xf32>
    %cst = arith.constant dense<0.000000e+00> : vector<16x1024xf32>
    %3 = tpu.matmul %0, %1, %cst {dimension_numbers = #tpu.dot_dimension_numbers<[1], [0], [0], [1], [0, 0, 1, 1], [], []>} : vector<16x32xbf16>, vector<32x1024xbf16>, vector<16x1024xf32> -> vector<16x1024xf32>
    %4 = vector.broadcast %2 : vector<1x1024xf32> to vector<16x1024xf32>
    %5 = arith.addf %3, %4 : vector<16x1024xf32>
    %cst_5 = arith.constant 0.000000e+00 : f32
    %6 = vector.broadcast %cst_5 : f32 to vector<16x1024xf32>
    %7 = arith.maximumf %5, %6 : vector<16x1024xf32>
    %8 = arith.truncf %7 : vector<16x1024xf32> to vector<16x1024xbf16>
    %c0_6 = arith.constant 0 : index
    %c0_7 = arith.constant 0 : index
    %9 = vector.load %arg3[%c0_6, %c0_7] : memref<1024x512xbf16, #tpu.memory_space<vmem>>, vector<1024x512xbf16>
    %c0_8 = arith.constant 0 : index
    %c1024 = arith.constant 1024 : index
    %10 = vector.load %arg7[%c0_8, %c1024] : memref<1x3200xf32, #tpu.memory_space<vmem>>, vector<1x512xf32>
    %cst_9 = arith.constant dense<0.000000e+00> : vector<16x512xf32>
    %11 = tpu.matmul %8, %9, %cst_9 {dimension_numbers = #tpu.dot_dimension_numbers<[1], [0], [0], [1], [0, 0, 1, 1], [], []>} : vector<16x1024xbf16>, vector<1024x512xbf16>, vector<16x512xf32> -> vector<16x512xf32>
    %12 = vector.broadcast %10 : vector<1x512xf32> to vector<16x512xf32>
    %13 = arith.addf %11, %12 : vector<16x512xf32>
    %cst_10 = arith.constant 0.000000e+00 : f32
    %14 = vector.broadcast %cst_10 : f32 to vector<16x512xf32>
    %15 = arith.maximumf %13, %14 : vector<16x512xf32>
    %16 = arith.truncf %15 : vector<16x512xf32> to vector<16x512xbf16>
    %c0_11 = arith.constant 0 : index
    %c0_12 = arith.constant 0 : index
    %17 = vector.load %arg4[%c0_11, %c0_12] : memref<512x768xbf16, #tpu.memory_space<vmem>>, vector<512x512xbf16>
    %c0_13 = arith.constant 0 : index
    %c1536 = arith.constant 1536 : index
    %18 = vector.load %arg7[%c0_13, %c1536] : memref<1x3200xf32, #tpu.memory_space<vmem>>, vector<1x512xf32>
    %cst_14 = arith.constant dense<0.000000e+00> : vector<16x512xf32>
    %19 = tpu.matmul %16, %17, %cst_14 {dimension_numbers = #tpu.dot_dimension_numbers<[1], [0], [0], [1], [0, 0, 1, 1], [], []>} : vector<16x512xbf16>, vector<512x512xbf16>, vector<16x512xf32> -> vector<16x512xf32>
    %20 = vector.broadcast %18 : vector<1x512xf32> to vector<16x512xf32>
    %21 = arith.addf %19, %20 : vector<16x512xf32>
    %cst_15 = arith.constant 0.000000e+00 : f32
    %22 = vector.broadcast %cst_15 : f32 to vector<16x512xf32>
    %23 = arith.maximumf %21, %22 : vector<16x512xf32>
    %24 = arith.truncf %23 : vector<16x512xf32> to vector<16x512xbf16>
    %c0_16 = arith.constant 0 : index
    %c512 = arith.constant 512 : index
    %25 = vector.load %arg4[%c0_16, %c512] : memref<512x768xbf16, #tpu.memory_space<vmem>>, vector<512x256xbf16>
    %c0_17 = arith.constant 0 : index
    %c2048 = arith.constant 2048 : index
    %26 = vector.load %arg7[%c0_17, %c2048] : memref<1x3200xf32, #tpu.memory_space<vmem>>, vector<1x256xf32>
    %cst_18 = arith.constant dense<0.000000e+00> : vector<16x256xf32>
    %27 = tpu.matmul %24, %25, %cst_18 {dimension_numbers = #tpu.dot_dimension_numbers<[1], [0], [0], [1], [0, 0, 1, 1], [], []>} : vector<16x512xbf16>, vector<512x256xbf16>, vector<16x256xf32> -> vector<16x256xf32>
    %28 = vector.broadcast %26 : vector<1x256xf32> to vector<16x256xf32>
    %29 = arith.addf %27, %28 : vector<16x256xf32>
    %cst_19 = arith.constant 0.000000e+00 : f32
    %30 = vector.broadcast %cst_19 : f32 to vector<16x256xf32>
    %31 = arith.maximumf %29, %30 : vector<16x256xf32>
    %32 = arith.truncf %31 : vector<16x256xf32> to vector<16x256xbf16>
    %c0_20 = arith.constant 0 : index
    %c0_21 = arith.constant 0 : index
    %33 = vector.load %arg5[%c0_20, %c0_21] : memref<256x384xbf16, #tpu.memory_space<vmem>>, vector<256x256xbf16>
    %c0_22 = arith.constant 0 : index
    %c2304 = arith.constant 2304 : index
    %34 = vector.load %arg7[%c0_22, %c2304] : memref<1x3200xf32, #tpu.memory_space<vmem>>, vector<1x256xf32>
    %cst_23 = arith.constant dense<0.000000e+00> : vector<16x256xf32>
    %35 = tpu.matmul %32, %33, %cst_23 {dimension_numbers = #tpu.dot_dimension_numbers<[1], [0], [0], [1], [0, 0, 1, 1], [], []>} : vector<16x256xbf16>, vector<256x256xbf16>, vector<16x256xf32> -> vector<16x256xf32>
    %36 = vector.broadcast %34 : vector<1x256xf32> to vector<16x256xf32>
    %37 = arith.addf %35, %36 : vector<16x256xf32>
    %cst_24 = arith.constant 0.000000e+00 : f32
    %38 = vector.broadcast %cst_24 : f32 to vector<16x256xf32>
    %39 = arith.maximumf %37, %38 : vector<16x256xf32>
    %40 = arith.truncf %39 : vector<16x256xf32> to vector<16x256xbf16>
    %c0_25 = arith.constant 0 : index
    %c256 = arith.constant 256 : index
    %41 = vector.load %arg5[%c0_25, %c256] : memref<256x384xbf16, #tpu.memory_space<vmem>>, vector<256x128xbf16>
    %c0_26 = arith.constant 0 : index
    %c2560 = arith.constant 2560 : index
    %42 = vector.load %arg7[%c0_26, %c2560] : memref<1x3200xf32, #tpu.memory_space<vmem>>, vector<1x128xf32>
    %cst_27 = arith.constant dense<0.000000e+00> : vector<16x128xf32>
    %43 = tpu.matmul %40, %41, %cst_27 {dimension_numbers = #tpu.dot_dimension_numbers<[1], [0], [0], [1], [0, 0, 1, 1], [], []>} : vector<16x256xbf16>, vector<256x128xbf16>, vector<16x128xf32> -> vector<16x128xf32>
    %44 = vector.broadcast %42 : vector<1x128xf32> to vector<16x128xf32>
    %45 = arith.addf %43, %44 : vector<16x128xf32>
    %cst_28 = arith.constant 0.000000e+00 : f32
    %46 = vector.broadcast %cst_28 : f32 to vector<16x128xf32>
    %47 = arith.maximumf %45, %46 : vector<16x128xf32>
    %48 = arith.truncf %47 : vector<16x128xf32> to vector<16x128xbf16>
    %c0_29 = arith.constant 0 : index
    %c0_30 = arith.constant 0 : index
    %49 = vector.load %arg6[%c0_29, %c0_30] : memref<128x512xbf16, #tpu.memory_space<vmem>>, vector<128x128xbf16>
    %c0_31 = arith.constant 0 : index
    %c2688 = arith.constant 2688 : index
    %50 = vector.load %arg7[%c0_31, %c2688] : memref<1x3200xf32, #tpu.memory_space<vmem>>, vector<1x128xf32>
    %cst_32 = arith.constant dense<0.000000e+00> : vector<16x128xf32>
    %51 = tpu.matmul %48, %49, %cst_32 {dimension_numbers = #tpu.dot_dimension_numbers<[1], [0], [0], [1], [0, 0, 1, 1], [], []>} : vector<16x128xbf16>, vector<128x128xbf16>, vector<16x128xf32> -> vector<16x128xf32>
    %52 = vector.broadcast %50 : vector<1x128xf32> to vector<16x128xf32>
    %53 = arith.addf %51, %52 : vector<16x128xf32>
    %cst_33 = arith.constant 0.000000e+00 : f32
    %54 = vector.broadcast %cst_33 : f32 to vector<16x128xf32>
    %55 = arith.maximumf %53, %54 : vector<16x128xf32>
    %56 = arith.truncf %55 : vector<16x128xf32> to vector<16x128xbf16>
    %c0_34 = arith.constant 0 : index
    %c128 = arith.constant 128 : index
    %57 = vector.load %arg6[%c0_34, %c128] : memref<128x512xbf16, #tpu.memory_space<vmem>>, vector<128x128xbf16>
    %c0_35 = arith.constant 0 : index
    %c2816 = arith.constant 2816 : index
    %58 = vector.load %arg7[%c0_35, %c2816] : memref<1x3200xf32, #tpu.memory_space<vmem>>, vector<1x128xf32>
    %cst_36 = arith.constant dense<0.000000e+00> : vector<16x128xf32>
    %59 = tpu.matmul %56, %57, %cst_36 {dimension_numbers = #tpu.dot_dimension_numbers<[1], [0], [0], [1], [0, 0, 1, 1], [], []>} : vector<16x128xbf16>, vector<128x128xbf16>, vector<16x128xf32> -> vector<16x128xf32>
    %60 = vector.broadcast %58 : vector<1x128xf32> to vector<16x128xf32>
    %61 = arith.addf %59, %60 : vector<16x128xf32>
    %cst_37 = arith.constant 0.000000e+00 : f32
    %62 = vector.broadcast %cst_37 : f32 to vector<16x128xf32>
    %63 = arith.maximumf %61, %62 : vector<16x128xf32>
    %64 = arith.truncf %63 : vector<16x128xf32> to vector<16x128xbf16>
    %c0_38 = arith.constant 0 : index
    %c256_39 = arith.constant 256 : index
    %65 = vector.load %arg6[%c0_38, %c256_39] : memref<128x512xbf16, #tpu.memory_space<vmem>>, vector<128x128xbf16>
    %c0_40 = arith.constant 0 : index
    %c2944 = arith.constant 2944 : index
    %66 = vector.load %arg7[%c0_40, %c2944] : memref<1x3200xf32, #tpu.memory_space<vmem>>, vector<1x128xf32>
    %cst_41 = arith.constant dense<0.000000e+00> : vector<16x128xf32>
    %67 = tpu.matmul %64, %65, %cst_41 {dimension_numbers = #tpu.dot_dimension_numbers<[1], [0], [0], [1], [0, 0, 1, 1], [], []>} : vector<16x128xbf16>, vector<128x128xbf16>, vector<16x128xf32> -> vector<16x128xf32>
    %68 = vector.broadcast %66 : vector<1x128xf32> to vector<16x128xf32>
    %69 = arith.addf %67, %68 : vector<16x128xf32>
    %cst_42 = arith.constant 0.000000e+00 : f32
    %70 = vector.broadcast %cst_42 : f32 to vector<16x128xf32>
    %71 = arith.maximumf %69, %70 : vector<16x128xf32>
    %72 = arith.truncf %71 : vector<16x128xf32> to vector<16x128xbf16>
    %c0_43 = arith.constant 0 : index
    %c384 = arith.constant 384 : index
    %73 = vector.load %arg6[%c0_43, %c384] : memref<128x512xbf16, #tpu.memory_space<vmem>>, vector<128x128xbf16>
    %c0_44 = arith.constant 0 : index
    %c3072 = arith.constant 3072 : index
    %74 = vector.load %arg7[%c0_44, %c3072] : memref<1x3200xf32, #tpu.memory_space<vmem>>, vector<1x128xf32>
    %cst_45 = arith.constant dense<0.000000e+00> : vector<16x128xf32>
    %75 = tpu.matmul %72, %73, %cst_45 {dimension_numbers = #tpu.dot_dimension_numbers<[1], [0], [0], [1], [0, 0, 1, 1], [], []>} : vector<16x128xbf16>, vector<128x128xbf16>, vector<16x128xf32> -> vector<16x128xf32>
    %76 = vector.broadcast %74 : vector<1x128xf32> to vector<16x128xf32>
    %77 = arith.addf %75, %76 : vector<16x128xf32>
    %c0_46 = arith.constant 0 : index
    %c0_47 = arith.constant 0 : index
    %78 = vector.load %arg8[%c0_46, %c0_47] : memref<16x128xf32, #tpu.memory_space<vmem>>, vector<16x128xf32>
    tpu.vector_store %arg8[%c0_46, %c0_47], %77 {strides = array<i32>} : memref<16x128xf32, #tpu.memory_space<vmem>>, vector<16x128xf32>,
    return
  }
  func.func @transform_0(%arg0: i32) -> (i32, i32) {
    %c0_i32 = arith.constant 0 : i32
    %c0_i32_0 = arith.constant 0 : i32
    return %arg0, %c0_i32 : i32, i32
  }
  func.func @transform_1(%arg0: i32) -> (i32, i32) {
    %c0_i32 = arith.constant 0 : i32
    %c0_i32_0 = arith.constant 0 : i32
    %c0_i32_1 = arith.constant 0 : i32
    return %c0_i32, %c0_i32_0 : i32, i32
  }
  func.func @transform_2(%arg0: i32) -> (i32, i32) {
    %c0_i32 = arith.constant 0 : i32
    %c0_i32_0 = arith.constant 0 : i32
    %c0_i32_1 = arith.constant 0 : i32
    return %c0_i32, %c0_i32_0 : i32, i32
  }
  func.func @transform_3(%arg0: i32) -> (i32, i32) {
    %c0_i32 = arith.constant 0 : i32
    %c0_i32_0 = arith.constant 0 : i32
    %c0_i32_1 = arith.constant 0 : i32
    return %c0_i32, %c0_i32_0 : i32, i32
  }
  func.func @transform_4(%arg0: i32) -> (i32, i32) {
    %c0_i32 = arith.constant 0 : i32
    %c0_i32_0 = arith.constant 0 : i32
    %c0_i32_1 = arith.constant 0 : i32
    return %c0_i32, %c0_i32_0 : i32, i32
  }
  func.func @transform_5(%arg0: i32) -> (i32, i32) {
    %c0_i32 = arith.constant 0 : i32
    %c0_i32_0 = arith.constant 0 : i32
    %c0_i32_1 = arith.constant 0 : i32
    return %c0_i32, %c0_i32_0 : i32, i32
  }
  func.func @transform_6(%arg0: i32) -> (i32, i32) {
    %c0_i32 = arith.constant 0 : i32
    %c0_i32_0 = arith.constant 0 : i32
    %c0_i32_1 = arith.constant 0 : i32
    return %c0_i32, %c0_i32_0 : i32, i32
  }
  func.func @transform_7(%arg0: i32) -> (i32, i32) {
    %c0_i32 = arith.constant 0 : i32
    %c0_i32_0 = arith.constant 0 : i32
    return %arg0, %c0_i32 : i32, i32
  }
}

</mosaic_0001>

<bundles_post_ra>
// kernel: tpu_custom_call.1
= control target key start
LH: loop header
LB: loop body
LE: loop exit
PB: predicated region body
PF: predicated region fallthrough
CT: control target
= control target key end

     0   :  { %12 = vsyncpa [#allocation3], 0  ;;  %s6783_s0 = inlined_call_operand.hbm [shape: bf16[16,32], index: 0, kind: input, shape index: {}]   ;;  %s6784_s1 = inlined_call_operand.hbm [shape: bf16[32,1024], index: 1, kind: input, shape index: {}]   ;;  %s6785_s2 = inlined_call_operand.hbm [shape: bf16[1024,512], index: 2, kind: input, shape index: {}]   ;;  %s6786_s3 = inlined_call_operand.hbm [shape: bf16[512,768], index: 3, kind: input, shape index: {}]   ;;  %s6787_s4 = inlined_call_operand.hbm [shape: bf16[256,384], index: 4, kind: input, shape index: {}]   ;;  %s6788_s5 = inlined_call_operand.hbm [shape: bf16[128,512], index: 5, kind: input, shape index: {}]   ;;  %s6789_s6 = inlined_call_operand.hbm [shape: f32[1,3200], index: 6, kind: input, shape index: {}]   ;;  %s6790_s7 = inlined_call_operand.hbm [shape: f32[16,128], index: 7, kind: output, shape index: {}]  }
   0x1   :  { %13 = vsyncpa [#allocation6], 0 }
   0x2   :  { %14 = vsyncpa [#allocation9], 0 }
   0x3   :  { %15 = vsyncpa [#allocation12], 0 }
   0x4   :  { %16 = vsyncpa [#allocation4], 0  ;;  %s6479_s24 = smov [#allocation5]   ;;  %s6293_s28 = scalar_lea.hbm %s6784_s1, 2048 }
   0x5   :  { %s34_s25 = sshll.u32 %s6479_s24, 4  ;;  %p6294_p0 = scmp.ne.s32.totalorder %s6784_s1, %s6293_s28  ;;  %s35_s25 = int_to_ptr.vmem [resolvable:$true] %s34_s25 }
   0x6   :  { %p6297_p1 = scmp.lt.u32.totalorder %s6293_s28, %s6784_s1 }
   0x8   :  { %p6299_p2 = pnand %p6297_p1, %p6294_p0 }
   0xa   :  { %6302 = shalt.err (!%p6299_p2)
}
   0xb   :  { %s6303_s10 = scalar_lea.vmem %s35_s25, 2048  ;;  %p6308_p4 = scmp.lt.s32.totalorder %s35_s25, %s35_s25 }
   0xc   :  { %p6304_p3 = scmp.ne.s32.totalorder %s35_s25, %s6303_s10  ;;  %p6309_p5 = scmp.lt.s32.totalorder %s6303_s10, %s6303_s10 }
   0xe   :  { %p6310_p6 = por %p6309_p5, %p6308_p4 }
  0x10   :  { %p6311_p7 = pnand %p6310_p6, %p6304_p3 }
  0x12   :  { %6314 = shalt.err (!%p6311_p7)
}
  0x13   :  { %s6480_s11 = smov 512   ;;  %s6481_s12 = smov 32  }
  0x14   :  { %40 = dma.hbm_to_vmem [thread:$0]  %s6784_s1, 2048, %s35_s25, [#allocation6], %s6480_s11, %s6480_s11, %s6481_s12  }
  0x15   :  { %s6482_s15 = smov [#allocation8]   ;;  %s6315_s19 = scalar_lea.hbm %s6786_s3, 24576 }
  0x16   :  { %s58_s16 = sshll.u32 %s6482_s15, 4  ;;  %p6316_p8 = scmp.ne.s32.totalorder %s6786_s3, %s6315_s19  ;;  %s59_s16 = int_to_ptr.vmem [resolvable:$true] %s58_s16 }
  0x17   :  { %p6319_p9 = scmp.lt.u32.totalorder %s6315_s19, %s6786_s3 }
  0x19   :  { %p6321_p10 = pnand %p6319_p9, %p6316_p8 }
  0x1b   :  { %6324 = shalt.err (!%p6321_p10)
}
  0x1c   :  { %s6325_s24 = scalar_lea.vmem %s59_s16, 24576  ;;  %p6330_p12 = scmp.lt.s32.totalorder %s59_s16, %s59_s16 }
  0x1d   :  { %p6326_p11 = scmp.ne.s32.totalorder %s59_s16, %s6325_s24  ;;  %p6331_p13 = scmp.lt.s32.totalorder %s6325_s24, %s6325_s24 }
  0x1f   :  { %p6332_p0 = por %p6331_p13, %p6330_p12 }
  0x21   :  { %p6333_p1 = pnand %p6332_p0, %p6326_p11 }
  0x23   :  { %6336 = shalt.err (!%p6333_p1)
}
  0x24   :  { %s6483_s1 = smov 384   ;;  %s6484_s25 = smov 24  }
  0x25   :  { %64 = dma.hbm_to_vmem [thread:$0]  %s6786_s3, 24576, %s59_s16, [#allocation9], %s6483_s1, %s6483_s1, %s6484_s25  }
  0x26   :  { %s6485_s28 = smov [#allocation11]   ;;  %s6486_s30 = smov [#allocation2]  }
  0x27   :  { %s82_s29 = sshll.u32 %s6485_s28, 4  ;;  %s22_s8 = sshll.u32 %s6486_s30, 4  ;;  %s83_s29 = int_to_ptr.vmem [resolvable:$true] %s82_s29  ;;  %s6566_s8 = int_to_ptr.vmem [resolvable:$true] %s22_s8 }
  0x28   :  { %s6337_s11 = scalar_lea.hbm %s6788_s5, 4096 }
  0x29   :  { %p6338_p2 = scmp.ne.s32.totalorder %s6788_s5, %s6337_s11  ;;  %p6341_p3 = scmp.lt.u32.totalorder %s6337_s11, %s6788_s5 }
  0x2b   :  { %p6343_p4 = pnand %p6341_p3, %p6338_p2 }
  0x2d   :  { %6346 = shalt.err (!%p6343_p4)
}
  0x2e   :  { %s6347_s3 = scalar_lea.vmem %s83_s29, 4096  ;;  %p6352_p6 = scmp.lt.s32.totalorder %s83_s29, %s83_s29 }
  0x2f   :  { %p6348_p5 = scmp.ne.s32.totalorder %s83_s29, %s6347_s3  ;;  %p6353_p7 = scmp.lt.s32.totalorder %s6347_s3, %s6347_s3 }
  0x31   :  { %p6354_p8 = por %p6353_p7, %p6352_p6 }
  0x33   :  { %p6355_p9 = pnand %p6354_p8, %p6348_p5 }
  0x35   :  { %6358 = shalt.err (!%p6355_p9)
}
  0x36   :  { %s6487_s16 = smov 256   ;;  %s6488_s17 = smov 16  }
  0x37   :  { %88 = dma.hbm_to_vmem [thread:$0]  %s6788_s5, 4096, %s83_s29, [#allocation12], %s6487_s16, %s6487_s16, %s6488_s17  }
  0x38   :  { %s6359_s22 = scalar_lea.hbm %s6783_s0, 128 }
  0x39   :  { %p6360_p10 = scmp.ne.s32.totalorder %s6783_s0, %s6359_s22  ;;  %p6363_p11 = scmp.lt.u32.totalorder %s6359_s22, %s6783_s0 }
  0x3b   :  { %p6365_p12 = pnand %p6363_p11, %p6360_p10 }
  0x3d   :  { %6368 = shalt.err (!%p6365_p12)
}
  0x3e   :  { %s6369_s26 = scalar_lea.vmem %s6566_s8, 128  ;;  %p6374_p0 = scmp.lt.s32.totalorder %s6566_s8, %s6566_s8 }
  0x3f   :  { %p6370_p13 = scmp.ne.s32.totalorder %s6566_s8, %s6369_s26  ;;  %p6375_p1 = scmp.lt.s32.totalorder %s6369_s26, %s6369_s26 }
  0x41   :  { %p6376_p2 = por %p6375_p1, %p6374_p0 }
  0x43   :  { %p6377_p3 = pnand %p6376_p2, %p6370_p13 }
  0x45   :  { %6380 = shalt.err (!%p6377_p3)
}
  0x46   :  { %s6489_s5 = smov 64   ;;  %s6490_s27 = smov 4  }
  0x47   :  { %28 = dma.hbm_to_vmem [thread:$0]  %s6783_s0, 128, %s6566_s8, [#allocation3], %s6489_s5, %s6489_s5, %s6490_s27  }
  0x48   :  { %s6491_s30 = smov [#allocation7]   ;;  %s6492_s10 = smov [#allocation10]  }
  0x49   :  { %s46_s9 = sshll.u32 %s6491_s30, 4  ;;  %s70_s11 = sshll.u32 %s6492_s10, 4  ;;  %s47_s9 = int_to_ptr.vmem [resolvable:$true] %s46_s9  ;;  %s6600_s11 = int_to_ptr.vmem [resolvable:$true] %s70_s11 }
  0x4a   :  { %s6381_s14 = scalar_lea.hbm %s6785_s2, 32768 }
  0x4b   :  { %p6382_p4 = scmp.ne.s32.totalorder %s6785_s2, %s6381_s14  ;;  %p6385_p5 = scmp.lt.u32.totalorder %s6381_s14, %s6785_s2 }
  0x4d   :  { %p6387_p6 = pnand %p6385_p5, %p6382_p4 }
  0x4f   :  { %6390 = shalt.err (!%p6387_p6)
}
  0x50   :  { %s6391_s0 = scalar_lea.vmem %s47_s9, 32768  ;;  %p6396_p8 = scmp.lt.s32.totalorder %s47_s9, %s47_s9 }
  0x51   :  { %p6392_p7 = scmp.ne.s32.totalorder %s47_s9, %s6391_s0  ;;  %p6397_p9 = scmp.lt.s32.totalorder %s6391_s0, %s6391_s0 }
  0x53   :  { %p6398_p10 = por %p6397_p9, %p6396_p8 }
  0x55   :  { %p6399_p11 = pnand %p6398_p10, %p6392_p7 }
  0x57   :  { %6402 = shalt.err (!%p6399_p11)
}
  0x58   :  { %52 = dma.hbm_to_vmem [thread:$0]  %s6785_s2, 32768, %s47_s9, [#allocation6], %s6487_s16, %s6487_s16, %s6488_s17  }
  0x59   :  { %s6403_s23 = scalar_lea.hbm %s6787_s4, 6144 }
  0x5a   :  { %p6404_p12 = scmp.ne.s32.totalorder %s6787_s4, %s6403_s23  ;;  %p6407_p13 = scmp.lt.u32.totalorder %s6403_s23, %s6787_s4 }
  0x5c   :  { %p6409_p0 = pnand %p6407_p13, %p6404_p12 }
  0x5e   :  { %6412 = shalt.err (!%p6409_p0)
}
  0x5f   :  { %s6413_s5 = scalar_lea.vmem %s6600_s11, 6144  ;;  %p6418_p2 = scmp.lt.s32.totalorder %s6600_s11, %s6600_s11 }
  0x60   :  { %p6414_p1 = scmp.ne.s32.totalorder %s6600_s11, %s6413_s5  ;;  %p6419_p3 = scmp.lt.s32.totalorder %s6413_s5, %s6413_s5 }
  0x62   :  { %p6420_p4 = por %p6419_p3, %p6418_p2 }
  0x64   :  { %p6421_p5 = pnand %p6420_p4, %p6414_p1 }
  0x66   :  { %6424 = shalt.err (!%p6421_p5)
}
  0x67   :  { %s6493_s2 = smov 192   ;;  %s6494_s16 = smov 12  }
  0x68   :  { %76 = dma.hbm_to_vmem [thread:$0]  %s6787_s4, 6144, %s6600_s11, [#allocation9], %s6493_s2, %s6493_s2, %s6494_s16  }
  0x69   :  { %s6495_s28 = smov [#allocation13]   ;;  %s6425_s10 = scalar_lea.hbm %s6789_s6, 400 }
  0x6a   :  { %s95_s29 = sshll.u32 %s6495_s28, 4  ;;  %p6426_p6 = scmp.ne.s32.totalorder %s6789_s6, %s6425_s10  ;;  %s96_s29 = int_to_ptr.vmem [resolvable:$true] %s95_s29 }
  0x6b   :  { %p6429_p7 = scmp.lt.u32.totalorder %s6425_s10, %s6789_s6 }
  0x6d   :  { %p6431_p8 = pnand %p6429_p7, %p6426_p6 }
  0x6f   :  { %6434 = shalt.err (!%p6431_p8)
}
  0x70   :  { %s6435_s3 = scalar_lea.vmem %s96_s29, 400  ;;  %s6439_s4 = scalar_lea.vmem %s96_s29, 416 }
  0x71   :  { %p6436_p9 = scmp.ne.s32.totalorder %s96_s29, %s6435_s3  ;;  %p6440_p10 = scmp.lt.s32.totalorder %s96_s29, %s96_s29 }
  0x72   :  { %p6441_p11 = scmp.lt.s32.totalorder %s6439_s4, %s6435_s3 }
  0x74   :  { %p6442_p12 = por %p6441_p11, %p6440_p10 }
  0x76   :  { %p6443_p13 = pnand %p6442_p12, %p6436_p9 }
  0x78   :  { %6446 = shalt.err (!%p6443_p13)
}
  0x79   :  { %98 = dma.hbm_to_vmem [thread:$0]  %s6789_s6, 400, %s96_s29, [#allocation12]  }
  0x7a   :  { %6469 = dma.done.wait [#allocation3], 128  }
  0x7b   :  { %6470 = vsyncadd [#allocation3], 4294967168 }
  0x7c   :  { %6471 = dma.done.wait [#allocation6], 34816  }
  0x7d   :  { %6472 = vsyncadd [#allocation6], 4294932480 }
  0x7e   :  { %6473 = dma.done.wait [#allocation9], 30720  }
  0x7f   :  { %6474 = vsyncadd [#allocation9], 4294936576 }
  0x80   :  { %6475 = dma.done.wait [#allocation12], 4496  }
  0x81   :  { %6476 = vsyncadd [#allocation12], 4294962800  ;;  %v6496_v0 = vmov 0   ;;  %v123_v1 = vld [vmem:[#allocation5] sm:$0xff]  ;;  %v124_v8 = vld [vmem:[#allocation5 + $0x8] sm:$0xff]  ;;  %vm266_vm0 = vcmask 261120  }
  0x82   :  { %302 = vmatprep.mubr.bf16.mxu1 %v6496_v0  ;;  %v127_v2 = vld [vmem:[#allocation5 + $0x20] sm:$0xff]  ;;  %v128_v9 = vld [vmem:[#allocation5 + $0x28] sm:$0xff]  ;;  %v6647_v11 = vld [vmem:[#allocation2] sm:$0xff]   ;;  %vm6498_vm1 = vmmov 0   ;;  %s6499_s6 = smov [#allocation14]  }
  0x83   :  { %v131_v3 = vld [vmem:[#allocation5 + $0x40] sm:$0xff]  ;;  %v4755_v4 = vcombine.high %v123_v1, %v127_v2  ;;  %v4754_v5 = vcombine.low %v123_v1, %v127_v2  ;;  %v4757_v12 = vcombine.high %v124_v8, %v128_v9  ;;  %v132_v13 = vld [vmem:[#allocation5 + $0x48] sm:$0xff]  ;;  %v4756_v16 = vcombine.low %v124_v8, %v128_v9  ;;  %v125_v17 = vld [vmem:[#allocation5 + $0x10] sm:$0xff]  ;;  %s4738_s19 = sshll.u32 %s6499_s6, 4  ;;  %s4739_s19 = int_to_ptr.vmem [resolvable:$true] %s4738_s19 }
  0x84   :  { %v135_v6 = vld [vmem:[#allocation5 + $0x60] sm:$0xff]  ;;  %v136_v14 = vld [vmem:[#allocation5 + $0x68] sm:$0xff]  ;;  %v129_v21 = vld [vmem:[#allocation5 + $0x30] sm:$0xff]  ;;  %s6447_s0 = scalar_lea.vmem %s4739_s19, 256  ;;  %p6452_p1 = scmp.lt.s32.totalorder %s4739_s19, %s4739_s19 }
  0x85   :  { %v4763_v7 = vcombine.high %v131_v3, %v135_v6  ;;  %270 = vmatprep.subr.bf16.mxu1 %v4755_v4  ;;  %v4762_v10 = vcombine.low %v131_v3, %v135_v6  ;;  %v5525_v15 = vld [vmem:[#allocation7 + $0x4] ss:$16 sps:$4 sm:$0xff]   ;;  %v5530_v18 = vld [vmem:[#allocation7] ss:$16 sps:$4 sm:$0xff]   ;;  %v4765_v19 = vcombine.high %v132_v13, %v136_v14  ;;  %v4764_v23 = vcombine.low %v132_v13, %v136_v14  ;;  %v126_v31 = vld [vmem:[#allocation5 + $0x18] sm:$0xff]  ;;  %p6448_p0 = scmp.ne.s32.totalorder %s4739_s19, %s6447_s0  ;;  %p6453_p2 = scmp.lt.s32.totalorder %s6447_s0, %s6447_s0 }
  0x86   :  { %271 = vmatpush1.bf16.msra.mxu1 %v4754_v5  ;;  %2024 = vmatprep.subr.bf16.mxu0 %v5525_v15  ;;  %v5531_v20 = vld [vmem:[#allocation7 + $0x24] ss:$16 sps:$4 sm:$0xff]   ;;  %v5536_v22 = vld [vmem:[#allocation7 + $0x20] ss:$16 sps:$4 sm:$0xff]   ;;  %v4759_v25 = vcombine.high %v125_v17, %v129_v21  ;;  %v4758_v30 = vcombine.low %v125_v17, %v129_v21  ;;  %v130_v33 = vld [vmem:[#allocation5 + $0x38] sm:$0xff] }
  0x87   :  { %272 = vmatprep.subr.bf16.mxu1 %v4763_v7  ;;  %2025 = vmatpush1.bf16.msra.mxu0 %v5530_v18  ;;  %v5537_v24 = vld [vmem:[#allocation7 + $0x44] ss:$16 sps:$4 sm:$0xff]   ;;  %v5542_v28 = vld [vmem:[#allocation7 + $0x40] ss:$16 sps:$4 sm:$0xff]   ;;  %v4761_v37 = vcombine.high %v126_v31, %v130_v33  ;;  %v134_v38 = vld [vmem:[#allocation5 + $0x58] sm:$0xff]  ;;  %v4760_v42 = vcombine.low %v126_v31, %v130_v33  ;;  %p6454_p3 = por %p6453_p2, %p6452_p1 }
  0x88   :  { %2026 = vmatprep.subr.bf16.mxu0 %v5531_v20  ;;  %v133_v26 = vld [vmem:[#allocation5 + $0x50] sm:$0xff]  ;;  %v138_v39 = vld [vmem:[#allocation5 + $0x78] sm:$0xff] }
  0x89   :  { %v137_v27 = vld [vmem:[#allocation5 + $0x70] sm:$0xff]  ;;  %v4769_v43 = vcombine.high %v134_v38, %v138_v39  ;;  %v4768_v46 = vcombine.low %v134_v38, %v138_v39  ;;  %v5529_v47 = vld [vmem:[#allocation7 + $0xc] ss:$16 sps:$4 sm:$0xff]   ;;  %v5527_v50 = vld [vmem:[#allocation7 + $0x8] ss:$16 sps:$4 sm:$0xff]   ;;  %p6455_p4 = pnand %p6454_p3, %p6448_p0 }
  0x8a   :  { %273 = vmatpush1.bf16.msra.mxu1 %v4762_v10  ;;  %v5543_v29 = vld [vmem:[#allocation7 + $0x64] ss:$16 sps:$4 sm:$0xff]   ;;  %v4767_v32 = vcombine.high %v133_v26, %v137_v27  ;;  %v5548_v34 = vld [vmem:[#allocation7 + $0x60] ss:$16 sps:$4 sm:$0xff]   ;;  %v4766_v36 = vcombine.low %v133_v26, %v137_v27  ;;  %v5535_v51 = vld [vmem:[#allocation7 + $0x2c] ss:$16 sps:$4 sm:$0xff]  }
  0x8b   :  { %313 = vmatprep.subr.bf16.mxu1 %v4757_v12  ;;  %2027 = vmatpush1.bf16.msra.mxu0 %v5536_v22  ;;  %v5549_v35 = vld [vmem:[#allocation7 + $0x84] ss:$16 sps:$4 sm:$0xff]   ;;  %v5554_v40 = vld [vmem:[#allocation7 + $0x80] ss:$16 sps:$4 sm:$0xff]   ;;  %v5533_v54 = vld [vmem:[#allocation7 + $0x28] ss:$16 sps:$4 sm:$0xff]  }
  0x8c   :  { %2028 = vmatprep.subr.bf16.mxu0 %v5537_v24  ;;  %v5555_v41 = vld [vmem:[#allocation7 + $0xa4] ss:$16 sps:$4 sm:$0xff]   ;;  %v5560_v44 = vld [vmem:[#allocation7 + $0xa0] ss:$16 sps:$4 sm:$0xff]   ;;  %v5541_v55 = vld [vmem:[#allocation7 + $0x4c] ss:$16 sps:$4 sm:$0xff]  }
  0x8d   :  { %4770 = vmatmul.mubr.msk.bf16.vlgmr.msra.gmra.mrb[0].mxu1 %vm266_vm0, %v6647_v11  ;;  %v5561_v45 = vld [vmem:[#allocation7 + $0xc4] ss:$16 sps:$4 sm:$0xff]   ;;  %v5566_v48 = vld [vmem:[#allocation7 + $0xc0] ss:$16 sps:$4 sm:$0xff]   ;;  %v5539_v58 = vld [vmem:[#allocation7 + $0x48] ss:$16 sps:$4 sm:$0xff]  }
  0x8e   :  { %314 = vmatpush1.bf16.msra.mxu1 %v4756_v16  ;;  %345 = vmatprep.mubr.bf16.mxu1 %v6496_v0  ;;  %v5567_v49 = vld [vmem:[#allocation7 + $0xe4] ss:$16 sps:$4 sm:$0xff]   ;;  %v5572_v52 = vld [vmem:[#allocation7 + $0xe0] ss:$16 sps:$4 sm:$0xff]   ;;  %v5547_v59 = vld [vmem:[#allocation7 + $0x6c] ss:$16 sps:$4 sm:$0xff]  }
  0x8f   :  { %315 = vmatprep.subr.bf16.mxu1 %v4765_v19  ;;  %2029 = vmatpush1.bf16.msra.mxu0 %v5542_v28  ;;  %v5573_v53 = vld [vmem:[#allocation7 + $0x104] ss:$16 sps:$4 sm:$0xff]   ;;  %v5578_v56 = vld [vmem:[#allocation7 + $0x100] ss:$16 sps:$4 sm:$0xff]   ;;  %v5545_v61 = vld [vmem:[#allocation7 + $0x68] ss:$16 sps:$4 sm:$0xff]  }
  0x90   :  { %2030 = vmatprep.subr.bf16.mxu0 %v5543_v29  ;;  %v5579_v57 = vld [vmem:[#allocation7 + $0x124] ss:$16 sps:$4 sm:$0xff]   ;;  %v5584_v60 = vld [vmem:[#allocation7 + $0x120] ss:$16 sps:$4 sm:$0xff]   ;;  %v5553_v62 = vld [vmem:[#allocation7 + $0x8c] ss:$16 sps:$4 sm:$0xff]  }
  0x91   :  { %v5585_v63 = vld [vmem:[#allocation7 + $0x144] ss:$16 sps:$4 sm:$0xff]   ;;  %v5551_v2 = vld [vmem:[#allocation7 + $0x88] ss:$16 sps:$4 sm:$0xff]   ;;  %v5559_v3 = vld [vmem:[#allocation7 + $0xac] ss:$16 sps:$4 sm:$0xff]  }
  0x92   :  { %316 = vmatpush1.bf16.msra.mxu1 %v4764_v23  ;;  %v5591_v1 = vld [vmem:[#allocation7 + $0x164] ss:$16 sps:$4 sm:$0xff]   ;;  %v5596_v4 = vld [vmem:[#allocation7 + $0x160] ss:$16 sps:$4 sm:$0xff]   ;;  %v5557_v6 = vld [vmem:[#allocation7 + $0xa8] ss:$16 sps:$4 sm:$0xff]  }
  0x93   :  { %356 = vmatprep.subr.bf16.mxu1 %v4759_v25  ;;  %2031 = vmatpush1.bf16.msra.mxu0 %v5548_v34  ;;  %v5597_v5 = vld [vmem:[#allocation7 + $0x184] ss:$16 sps:$4 sm:$0xff]   ;;  %v5565_v7 = vld [vmem:[#allocation7 + $0xcc] ss:$16 sps:$4 sm:$0xff]   ;;  %v5602_v8 = vld [vmem:[#allocation7 + $0x180] ss:$16 sps:$4 sm:$0xff]  }
  0x94   :  { %2032 = vmatprep.subr.bf16.mxu0 %v5549_v35  ;;  %v5603_v9 = vld [vmem:[#allocation7 + $0x1a4] ss:$16 sps:$4 sm:$0xff]   ;;  %v5563_v10 = vld [vmem:[#allocation7 + $0xc8] ss:$16 sps:$4 sm:$0xff]   ;;  %v5608_v12 = vld [vmem:[#allocation7 + $0x1a0] ss:$16 sps:$4 sm:$0xff]  }
  0x95   :  { %4771 = vmatmul.mubr.msk.bf16.vlgmr.msra.gmra.mrb[4].mxu1 %vm266_vm0, %v6647_v11  ;;  %v5569_v13 = vld [vmem:[#allocation7 + $0xe8] ss:$16 sps:$4 sm:$0xff]   ;;  %v5577_v14 = vld [vmem:[#allocation7 + $0x10c] ss:$16 sps:$4 sm:$0xff]   ;;  %v5609_v26 = vld [vmem:[#allocation7 + $0x1c4] ss:$16 sps:$4 sm:$0xff]  }
  0x96   :  { %357 = vmatpush1.bf16.msra.mxu1 %v4758_v30  ;;  %388 = vmatprep.mubr.bf16.mxu1 %v6496_v0  ;;  %v5575_v15 = vld [vmem:[#allocation7 + $0x108] ss:$16 sps:$4 sm:$0xff]   ;;  %v5583_v16 = vld [vmem:[#allocation7 + $0x12c] ss:$16 sps:$4 sm:$0xff]   ;;  %v5614_v29 = vld [vmem:[#allocation7 + $0x1c0] ss:$16 sps:$4 sm:$0xff]  }
  0x97   :  { %358 = vmatprep.subr.bf16.mxu1 %v4767_v32  ;;  %2033 = vmatpush1.bf16.msra.mxu0 %v5554_v40  ;;  %v5581_v17 = vld [vmem:[#allocation7 + $0x128] ss:$16 sps:$4 sm:$0xff]   ;;  %v5589_v18 = vld [vmem:[#allocation7 + $0x14c] ss:$16 sps:$4 sm:$0xff]   ;;  %v5615_v30 = vld [vmem:[#allocation7 + $0x1e4] ss:$16 sps:$4 sm:$0xff]  }
  0x98   :  { %2034 = vmatprep.subr.bf16.mxu0 %v5555_v41  ;;  %v5587_v19 = vld [vmem:[#allocation7 + $0x148] ss:$16 sps:$4 sm:$0xff]   ;;  %v5595_v20 = vld [vmem:[#allocation7 + $0x16c] ss:$16 sps:$4 sm:$0xff]   ;;  %v5620_v33 = vld [vmem:[#allocation7 + $0x1e0] ss:$16 sps:$4 sm:$0xff]  }
  0x99   :  { %v5593_v21 = vld [vmem:[#allocation7 + $0x168] ss:$16 sps:$4 sm:$0xff]   ;;  %v5601_v22 = vld [vmem:[#allocation7 + $0x18c] ss:$16 sps:$4 sm:$0xff]   ;;  %v5623_v34 = vld [vmem:[#allocation7 + $0x204] ss:$16 sps:$4 sm:$0xff]  }
  0x9a   :  { %359 = vmatpush1.bf16.msra.mxu1 %v4766_v36  ;;  %v5599_v23 = vld [vmem:[#allocation7 + $0x188] ss:$16 sps:$4 sm:$0xff]   ;;  %v5607_v24 = vld [vmem:[#allocation7 + $0x1ac] ss:$16 sps:$4 sm:$0xff]   ;;  %v141_v36 = vlaneseq  ;;  %v6662_v38 = vld [vmem:[#allocation13] sm:$0xff] }
  0x9b   :  { %399 = vmatprep.subr.bf16.mxu1 %v4761_v37  ;;  %2035 = vmatpush1.bf16.msra.mxu0 %v5560_v44  ;;  %v5605_v25 = vld [vmem:[#allocation7 + $0x1a8] ss:$16 sps:$4 sm:$0xff]   ;;  %v5613_v27 = vld [vmem:[#allocation7 + $0x1cc] ss:$16 sps:$4 sm:$0xff]  }
  0x9c   :  { %2036 = vmatprep.subr.bf16.mxu0 %v5561_v45  ;;  %v5611_v28 = vld [vmem:[#allocation7 + $0x1c8] ss:$16 sps:$4 sm:$0xff]   ;;  %v5619_v31 = vld [vmem:[#allocation7 + $0x1ec] ss:$16 sps:$4 sm:$0xff]   ;;  %v6660_v37 = vshrl.u32 %v141_v36, 7 }
  0x9d   :  { %4772 = vmatmul.mubr.msk.bf16.vlgmr.msra.gmra.mrb[8].mxu1 %vm266_vm0, %v6647_v11  ;;  %v5617_v32 = vld [vmem:[#allocation7 + $0x1e8] ss:$16 sps:$4 sm:$0xff]   ;;  %v5626_v35 = vld [vmem:[#allocation7 + $0x20c] ss:$16 sps:$4 sm:$0xff]  }
  0x9e   :  { %400 = vmatpush1.bf16.msra.mxu1 %v4760_v42  ;;  %431 = vmatprep.mubr.bf16.mxu1 %v6496_v0  ;;  %v5590_v0 = vld [vmem:[#allocation7 + $0x140] ss:$16 sps:$4 sm:$0xff]   ;;  %v6665_v39 = vsub.s32 0, %v6660_v37  ;;  %v6668_v40 = vsub.s32 1, %v6660_v37  ;;  %v5642_v36 = vld [vmem:[#allocation7 + $0x268] ss:$16 sps:$4 sm:$0xff]  }
  0x9f   :  { %401 = vmatprep.subr.bf16.mxu1 %v4769_v43  ;;  %2037 = vmatpush1.bf16.msra.mxu0 %v5566_v48 }
  0xa0   :  { %2038 = vmatprep.subr.bf16.mxu0 %v5567_v49  ;;  %v144_v41 = vrot.slane %v6662_v38, %v6665_v39  ;;  %v148_v42 = vrot.slane %v6662_v38, %v6668_v40  ;;  %v6678_v49 = vsub.s32 3, %v6660_v37 }
  0xa2   :  { %402 = vmatpush1.bf16.msra.mxu1 %v4768_v46  ;;  %v6675_v46 = vsub.s32 2, %v6660_v37 }
  0xa3   :  { %2196 = vmatprep.subr.bf16.mxu1 %v5529_v47  ;;  %2039 = vmatpush1.bf16.msra.mxu0 %v5572_v52 }
  0xa4   :  { %2040 = vmatprep.subr.bf16.mxu0 %v5573_v53 }
  0xa5   :  { %4773 = vmatmul.mubr.msk.bf16.vlgmr.msra.gmra.mrb[12].mxu1 %vm266_vm0, %v6647_v11  ;;  %v5571_v11 = vld [vmem:[#allocation7 + $0xec] ss:$16 sps:$4 sm:$0xff]  }
  0xa6   :  { %2197 = vmatpush1.bf16.msra.mxu1 %v5527_v50 }
  0xa7   :  { %2198 = vmatprep.subr.bf16.mxu1 %v5535_v51  ;;  %2041 = vmatpush1.bf16.msra.mxu0 %v5578_v56 }
  0xa8   :  { %2042 = vmatprep.subr.bf16.mxu0 %v5579_v57 }
  0xaa   :  { %2199 = vmatpush1.bf16.msra.mxu1 %v5533_v54 }
  0xab   :  { %2200 = vmatprep.subr.bf16.mxu1 %v5541_v55  ;;  %2043 = vmatpush1.bf16.msra.mxu0 %v5584_v60  ;;  %v152_v55 = vrot.slane %v6662_v38, %v6675_v46  ;;  %v156_v60 = vrot.slane %v6662_v38, %v6678_v49 }
  0xac   :  { %2044 = vmatprep.subr.bf16.mxu0 %v5585_v63 }
  0xae   :  { %2201 = vmatpush1.bf16.msra.mxu1 %v5539_v58  ;;  %v5621_v58 = vld [vmem:[#allocation7 + $0x200] ss:$16 sps:$4 sm:$0xff]  }
  0xaf   :  { %2202 = vmatprep.subr.bf16.mxu1 %v5547_v59  ;;  %2045 = vmatpush1.bf16.msra.mxu0 %v5590_v0  ;;  %v5624_v59 = vld [vmem:[#allocation7 + $0x208] ss:$16 sps:$4 sm:$0xff]  }
  0xb0   :  { %2046 = vmatprep.subr.bf16.mxu0 %v5591_v1  ;;  %v5632_v1 = vld [vmem:[#allocation7 + $0x22c] ss:$16 sps:$4 sm:$0xff]  }
  0xb2   :  { %2203 = vmatpush1.bf16.msra.mxu1 %v5545_v61 }
  0xb3   :  { %2204 = vmatprep.subr.bf16.mxu1 %v5553_v62  ;;  %2047 = vmatpush1.bf16.msra.mxu0 %v5596_v4  ;;  %v5629_v62 = vld [vmem:[#allocation7 + $0x224] ss:$16 sps:$4 sm:$0xff]   ;;  %v159_v4 = vsub.s32 4, %v6660_v37 }
  0xb4   :  { %2048 = vmatprep.subr.bf16.mxu0 %v5597_v5 }
  0xb6   :  { %2205 = vmatpush1.bf16.msra.mxu1 %v5551_v2 }
  0xb7   :  { %2206 = vmatprep.subr.bf16.mxu1 %v5559_v3  ;;  %2049 = vmatpush1.bf16.msra.mxu0 %v5602_v8 }
  0xb8   :  { %2050 = vmatprep.subr.bf16.mxu0 %v5603_v9 }
  0xba   :  { %2207 = vmatpush1.bf16.msra.mxu1 %v5557_v6 }
  0xbb   :  { %2208 = vmatprep.subr.bf16.mxu1 %v5565_v7  ;;  %2051 = vmatpush1.bf16.msra.mxu0 %v5608_v12  ;;  %v163_v7 = vsub.s32 5, %v6660_v37  ;;  %v5630_v12 = vld [vmem:[#allocation7 + $0x228] ss:$16 sps:$4 sm:$0xff]  }
  0xbc   :  { %2052 = vmatprep.subr.bf16.mxu0 %v5609_v26  ;;  %v5641_v26 = vld [vmem:[#allocation7 + $0x264] ss:$16 sps:$4 sm:$0xff]  }
  0xbe   :  { %2209 = vmatpush1.bf16.msra.mxu1 %v5563_v10 }
  0xbf   :  { %2210 = vmatprep.subr.bf16.mxu1 %v5571_v11  ;;  %2053 = vmatpush1.bf16.msra.mxu0 %v5614_v29  ;;  %v5627_v11 = vld [vmem:[#allocation7 + $0x220] ss:$16 sps:$4 sm:$0xff]  }
  0xc0   :  { %2054 = vmatprep.subr.bf16.mxu0 %v5615_v30 }
  0xc2   :  { %2211 = vmatpush1.bf16.msra.mxu1 %v5569_v13 }
  0xc3   :  { %2212 = vmatprep.subr.bf16.mxu1 %v5577_v14  ;;  %2055 = vmatpush1.bf16.msra.mxu0 %v5620_v33 }
  0xc4   :  { %2067 = vmatprep.subr.bf16.mxu0 %v5623_v34 }
  0xc6   :  { %2213 = vmatpush1.bf16.msra.mxu1 %v5575_v15  ;;  %v5635_v15 = vld [vmem:[#allocation7 + $0x244] ss:$16 sps:$4 sm:$0xff]  }
  0xc7   :  { %2214 = vmatprep.subr.bf16.mxu1 %v5583_v16  ;;  %v5638_v16 = vld [vmem:[#allocation7 + $0x24c] ss:$16 sps:$4 sm:$0xff]  }
  0xca   :  { %2215 = vmatpush1.bf16.msra.mxu1 %v5581_v17 }
  0xcb   :  { %2216 = vmatprep.subr.bf16.mxu1 %v5589_v18  ;;  %v160_v18 = vrot.slane %v6662_v38, %v159_v4  ;;  %v5672_v4 = vld [vmem:[#allocation7 + $0x308] ss:$16 sps:$4 sm:$0xff]  }
  0xce   :  { %2217 = vmatpush1.bf16.msra.mxu1 %v5587_v19 }
  0xcf   :  { %2218 = vmatprep.subr.bf16.mxu1 %v5595_v20  ;;  %v164_v20 = vrot.slane %v6662_v38, %v163_v7  ;;  %v5675_v7 = vld [vmem:[#allocation7 + $0x320] ss:$16 sps:$4 sm:$0xff]  }
  0xd2   :  { %2219 = vmatpush1.bf16.msra.mxu1 %v5593_v21 }
  0xd3   :  { %2220 = vmatprep.subr.bf16.mxu1 %v5601_v22  ;;  %v5633_v22 = vld [vmem:[#allocation7 + $0x240] ss:$16 sps:$4 sm:$0xff]  }
  0xd6   :  { %2221 = vmatpush1.bf16.msra.mxu1 %v5599_v23  ;;  %v5636_v23 = vld [vmem:[#allocation7 + $0x248] ss:$16 sps:$4 sm:$0xff]  }
  0xd7   :  { %2222 = vmatprep.subr.bf16.mxu1 %v5607_v24 }
  0xda   :  { %2223 = vmatpush1.bf16.msra.mxu1 %v5605_v25 }
  0xdb   :  { %2224 = vmatprep.subr.bf16.mxu1 %v5613_v27  ;;  %v5644_v27 = vld [vmem:[#allocation7 + $0x26c] ss:$16 sps:$4 sm:$0xff]  }
  0xde   :  { %2225 = vmatpush1.bf16.msra.mxu1 %v5611_v28 }
  0xdf   :  { %2226 = vmatprep.subr.bf16.mxu1 %v5619_v31 }
  0xe2   :  { %2227 = vmatpush1.bf16.msra.mxu1 %v5617_v32 }
  0xe3   :  { %2239 = vmatprep.subr.bf16.mxu1 %v5626_v35  ;;  %v5639_v35 = vld [vmem:[#allocation7 + $0x260] ss:$16 sps:$4 sm:$0xff]  }
 0x160   :  { %v304_v43 = vpop.f32.mrb[0].mxu1 }
 0x161   :  { %v305_v44 = vadd.f32 %v304_v43, %v144_v41  ;;  %v306_v45 = vpop.f32.mrb[1].mxu1  ;;  %v5647_v43 = vld [vmem:[#allocation7 + $0x284] ss:$16 sps:$4 sm:$0xff]  }
 0x162   :  { %v307_v47 = vadd.f32 %v306_v45, %v148_v42  ;;  %v308_v48 = vpop.f32.mrb[2].mxu1 }
 0x163   :  { %v309_v50 = vadd.f32 %v308_v48, %v144_v41  ;;  %v310_v51 = vpop.f32.mrb[3].mxu1  ;;  %v442_v53 = vmax.f32 %v305_v44, 0.0  ;;  %v5650_v44 = vld [vmem:[#allocation7 + $0x28c] ss:$16 sps:$4 sm:$0xff]  }
 0x164   :  { %v311_v52 = vadd.f32 %v310_v51, %v148_v42  ;;  %v443_v56 = vmax.f32 %v307_v47, 0.0  ;;  %v5648_v51 = vld [vmem:[#allocation7 + $0x288] ss:$16 sps:$4 sm:$0xff]  }
 0x165   :  { %v450_v54 = vmax.f32 %v309_v50, 0.0  ;;  %v5645_v50 = vld [vmem:[#allocation7 + $0x280] ss:$16 sps:$4 sm:$0xff]  }
 0x166   :  { %v451_v57 = vmax.f32 %v311_v52, 0.0 }
 0x167   :  { %v458_v61 = vpack.c.bf16 %v450_v54, %v442_v53  ;;  %v5653_v53 = vld [vmem:[#allocation7 + $0x2a4] ss:$16 sps:$4 sm:$0xff]   ;;  %v5656_v54 = vld [vmem:[#allocation7 + $0x2ac] ss:$16 sps:$4 sm:$0xff]  }
 0x168   :  { %v459_v63 = vpack.c.bf16 %v451_v57, %v443_v56  ;;  %v347_v0 = vpop.f32.mrb[4].mxu1  ;;  %v5654_v56 = vld [vmem:[#allocation7 + $0x2a8] ss:$16 sps:$4 sm:$0xff]   ;;  %v5659_v57 = vld [vmem:[#allocation7 + $0x2c4] ss:$16 sps:$4 sm:$0xff]  }
 0x169   :  { %v348_v2 = vadd.f32 %v347_v0, %v152_v55  ;;  %v349_v3 = vpop.f32.mrb[5].mxu1  ;;  %v5666_v0 = vld [vmem:[#allocation7 + $0x2e8] ss:$16 sps:$4 sm:$0xff]  }
 0x16a   :  { %2056 = vmatprep.mubr.bf16.mxu0 %v459_v63  ;;  %2228 = vmatprep.mubr.bf16.mxu1 %v459_v63  ;;  %v350_v5 = vadd.f32 %v349_v3, %v156_v60  ;;  %v351_v6 = vpop.f32.mrb[6].mxu1  ;;  %v5663_v63 = vld [vmem:[#allocation7 + $0x2e0] ss:$16 sps:$4 sm:$0xff]  }
 0x16b   :  { %2057 = vmatmul.mubr.bf16.vlgmr.msra.gmra.mrb[0].mxu0 %v458_v61  ;;  %2229 = vmatmul.mubr.bf16.vlgmr.msra.gmra.mrb[16].mxu1 %v458_v61  ;;  %v444_v8 = vmax.f32 %v348_v2, 0.0  ;;  %v352_v9 = vadd.f32 %v351_v6, %v152_v55  ;;  %v353_v10 = vpop.f32.mrb[7].mxu1  ;;  %v5651_v55 = vld [vmem:[#allocation7 + $0x2a0] ss:$16 sps:$4 sm:$0xff]   ;;  %v5665_v61 = vld [vmem:[#allocation7 + $0x2e4] ss:$16 sps:$4 sm:$0xff]  }
 0x16c   :  { %2068 = vmatpush1.bf16.msra.mxu0 %v5621_v58  ;;  %2240 = vmatpush1.bf16.msra.mxu1 %v5624_v59  ;;  %v445_v13 = vmax.f32 %v350_v5, 0.0  ;;  %v354_v14 = vadd.f32 %v353_v10, %v156_v60  ;;  %v5662_v58 = vld [vmem:[#allocation7 + $0x2cc] ss:$16 sps:$4 sm:$0xff]   ;;  %v5657_v59 = vld [vmem:[#allocation7 + $0x2c0] ss:$16 sps:$4 sm:$0xff]  }
 0x16d   :  { %2069 = vmatprep.subr.bf16.mxu0 %v5629_v62  ;;  %2241 = vmatprep.subr.bf16.mxu1 %v5632_v1  ;;  %v452_v17 = vmax.f32 %v352_v9, 0.0  ;;  %v5660_v60 = vld [vmem:[#allocation7 + $0x2c8] ss:$16 sps:$4 sm:$0xff]   ;;  %v5668_v62 = vld [vmem:[#allocation7 + $0x2ec] ss:$16 sps:$4 sm:$0xff]  }
 0x16e   :  { %v453_v19 = vmax.f32 %v354_v14, 0.0  ;;  %v5671_v1 = vld [vmem:[#allocation7 + $0x304] ss:$16 sps:$4 sm:$0xff]   ;;  %v5674_v2 = vld [vmem:[#allocation7 + $0x30c] ss:$16 sps:$4 sm:$0xff]  }
 0x16f   :  { %v6688_v21 = vpack.c.bf16 %v452_v17, %v444_v8  ;;  %v5669_v3 = vld [vmem:[#allocation7 + $0x300] ss:$16 sps:$4 sm:$0xff]   ;;  %v5677_v5 = vld [vmem:[#allocation7 + $0x324] ss:$16 sps:$4 sm:$0xff]   ;;  %v5680_v6 = vld [vmem:[#allocation7 + $0x32c] ss:$16 sps:$4 sm:$0xff]  }
 0x170   :  { %2070 = vmatpush1.bf16.msra.mxu0 %v5627_v11  ;;  %2242 = vmatpush1.bf16.msra.mxu1 %v5630_v12  ;;  %v461_v24 = vpack.c.bf16 %v453_v19, %v445_v13  ;;  %v390_v25 = vpop.f32.mrb[8].mxu1  ;;  %v5678_v8 = vld [vmem:[#allocation7 + $0x328] ss:$16 sps:$4 sm:$0xff]   ;;  %v5683_v9 = vld [vmem:[#allocation7 + $0x344] ss:$16 sps:$4 sm:$0xff]  }
 0x171   :  { %2071 = vmatprep.subr.bf16.mxu0 %v5635_v15  ;;  %2243 = vmatprep.subr.bf16.mxu1 %v5638_v16  ;;  %v391_v28 = vadd.f32 %v390_v25, %v160_v18  ;;  %v392_v29 = vpop.f32.mrb[9].mxu1  ;;  %v5686_v10 = vld [vmem:[#allocation7 + $0x34c] ss:$16 sps:$4 sm:$0xff]   ;;  %v5681_v11 = vld [vmem:[#allocation7 + $0x340] ss:$16 sps:$4 sm:$0xff]  }
 0x172   :  { %2099 = vmatprep.mubr.bf16.mxu0 %v461_v24  ;;  %2271 = vmatprep.mubr.bf16.mxu1 %v461_v24  ;;  %v393_v30 = vadd.f32 %v392_v29, %v164_v20  ;;  %v394_v31 = vpop.f32.mrb[10].mxu1  ;;  %v5684_v12 = vld [vmem:[#allocation7 + $0x348] ss:$16 sps:$4 sm:$0xff]   ;;  %v5689_v13 = vld [vmem:[#allocation7 + $0x364] ss:$16 sps:$4 sm:$0xff]  }
 0x173   :  { %v446_v32 = vmax.f32 %v391_v28, 0.0  ;;  %v395_v33 = vadd.f32 %v394_v31, %v160_v18  ;;  %v396_v34 = vpop.f32.mrb[11].mxu1  ;;  %v5692_v14 = vld [vmem:[#allocation7 + $0x36c] ss:$16 sps:$4 sm:$0xff]   ;;  %v5687_v15 = vld [vmem:[#allocation7 + $0x360] ss:$16 sps:$4 sm:$0xff]  }
 0x174   :  { %2072 = vmatpush1.bf16.msra.mxu0 %v5633_v22  ;;  %2244 = vmatpush1.bf16.msra.mxu1 %v5636_v23  ;;  %v447_v41 = vmax.f32 %v393_v30, 0.0  ;;  %v397_v42 = vadd.f32 %v396_v34, %v164_v20  ;;  %v5690_v16 = vld [vmem:[#allocation7 + $0x368] ss:$16 sps:$4 sm:$0xff]   ;;  %v5695_v17 = vld [vmem:[#allocation7 + $0x384] ss:$16 sps:$4 sm:$0xff]   ;;  %v171_v28 = vsub.s32 7, %v6660_v37 }
 0x175   :  { %2073 = vmatprep.subr.bf16.mxu0 %v5641_v26  ;;  %2245 = vmatprep.subr.bf16.mxu1 %v5644_v27  ;;  %v454_v45 = vmax.f32 %v395_v33, 0.0  ;;  %v5698_v18 = vld [vmem:[#allocation7 + $0x38c] ss:$16 sps:$4 sm:$0xff]   ;;  %v5693_v19 = vld [vmem:[#allocation7 + $0x380] ss:$16 sps:$4 sm:$0xff]   ;;  %v167_v26 = vsub.s32 6, %v6660_v37 }
 0x176   :  { %v455_v47 = vmax.f32 %v397_v42, 0.0  ;;  %v5696_v20 = vld [vmem:[#allocation7 + $0x388] ss:$16 sps:$4 sm:$0xff]   ;;  %v5701_v22 = vld [vmem:[#allocation7 + $0x3a4] ss:$16 sps:$4 sm:$0xff]   ;;  %v172_v33 = vrot.slane %v6662_v38, %v171_v28 }
 0x177   :  { %v6690_v48 = vpack.c.bf16 %v454_v45, %v446_v32  ;;  %v5704_v23 = vld [vmem:[#allocation7 + $0x3ac] ss:$16 sps:$4 sm:$0xff]   ;;  %v5699_v24 = vld [vmem:[#allocation7 + $0x3a0] ss:$16 sps:$4 sm:$0xff]   ;;  %v5702_v25 = vld [vmem:[#allocation7 + $0x3a8] ss:$16 sps:$4 sm:$0xff]   ;;  %v168_v32 = vrot.slane %v6662_v38, %v167_v26 }
 0x178   :  { %2074 = vmatpush1.bf16.msra.mxu0 %v5639_v35  ;;  %2246 = vmatpush1.bf16.msra.mxu1 %v5642_v36  ;;  %v6692_v52 = vpack.c.bf16 %v455_v47, %v447_v41  ;;  %v433_v27 = vpop.f32.mrb[12].mxu1  ;;  %v5707_v29 = vld [vmem:[#allocation7 + $0x3c4] ss:$16 sps:$4 sm:$0xff]   ;;  %v5710_v30 = vld [vmem:[#allocation7 + $0x3cc] ss:$16 sps:$4 sm:$0xff]  }
 0x179   :  { %2075 = vmatprep.subr.bf16.mxu0 %v5647_v43  ;;  %2247 = vmatprep.subr.bf16.mxu1 %v5650_v44  ;;  %v435_v31 = vpop.f32.mrb[13].mxu1  ;;  %v5705_v36 = vld [vmem:[#allocation7 + $0x3c0] ss:$16 sps:$4 sm:$0xff]   ;;  %v5708_v41 = vld [vmem:[#allocation7 + $0x3c8] ss:$16 sps:$4 sm:$0xff]   ;;  %v434_v42 = vadd.f32 %v433_v27, %v168_v32 }
 0x17a   :  { %v437_v34 = vpop.f32.mrb[14].mxu1  ;;  %v436_v43 = vadd.f32 %v435_v31, %v172_v33  ;;  %v5713_v37 = vld [vmem:[#allocation7 + $0x3e4] ss:$16 sps:$4 sm:$0xff]   ;;  %v5716_v45 = vld [vmem:[#allocation7 + $0x3ec] ss:$16 sps:$4 sm:$0xff]  }
 0x17b   :  { %v439_v35 = vpop.f32.mrb[15].mxu1  ;;  %v438_v44 = vadd.f32 %v437_v34, %v168_v32  ;;  %v5711_v38 = vld [vmem:[#allocation7 + $0x3e0] ss:$16 sps:$4 sm:$0xff]   ;;  %v5770_v26 = vld [vmem:[#allocation7 + $0x50c] ss:$16 sps:$4 sm:$0xff]  }
 0x17c   :  { %2076 = vmatpush1.bf16.msra.mxu0 %v5645_v50  ;;  %2248 = vmatpush1.bf16.msra.mxu1 %v5648_v51  ;;  %v440_v47 = vadd.f32 %v439_v35, %v172_v33  ;;  %v448_v50 = vmax.f32 %v434_v42, 0.0  ;;  %v449_v51 = vmax.f32 %v436_v43, 0.0  ;;  %v5765_v27 = vld [vmem:[#allocation7 + $0x500] ss:$16 sps:$4 sm:$0xff]   ;;  %v5768_v28 = vld [vmem:[#allocation7 + $0x508] ss:$16 sps:$4 sm:$0xff]  }
 0x17d   :  { %2077 = vmatprep.subr.bf16.mxu0 %v5653_v53  ;;  %2249 = vmatprep.subr.bf16.mxu1 %v5656_v54  ;;  %v456_v53 = vmax.f32 %v438_v44, 0.0  ;;  %v5771_v31 = vld [vmem:[#allocation7 + $0x520] ss:$16 sps:$4 sm:$0xff]   ;;  %v5774_v32 = vld [vmem:[#allocation7 + $0x528] ss:$16 sps:$4 sm:$0xff]  }
 0x17e   :  { %v457_v54 = vmax.f32 %v440_v47, 0.0  ;;  %v5779_v33 = vld [vmem:[#allocation7 + $0x544] ss:$16 sps:$4 sm:$0xff]   ;;  %v5782_v34 = vld [vmem:[#allocation7 + $0x54c] ss:$16 sps:$4 sm:$0xff]  }
 0x17f   :  { %v5777_v35 = vld [vmem:[#allocation7 + $0x540] ss:$16 sps:$4 sm:$0xff]   ;;  %v5788_v42 = vld [vmem:[#allocation7 + $0x56c] ss:$16 sps:$4 sm:$0xff]   ;;  %v5786_v44 = vld [vmem:[#allocation7 + $0x568] ss:$16 sps:$4 sm:$0xff]  }
 0x180   :  { %2078 = vmatpush1.bf16.msra.mxu0 %v5651_v55  ;;  %2250 = vmatpush1.bf16.msra.mxu1 %v5654_v56  ;;  %v5714_v55 = vld [vmem:[#allocation7 + $0x3e8] ss:$16 sps:$4 sm:$0xff]   ;;  %v6698_v56 = vpack.c.bf16 %v456_v53, %v448_v50  ;;  %v5783_v43 = vld [vmem:[#allocation7 + $0x560] ss:$16 sps:$4 sm:$0xff]   ;;  %v5800_v53 = vld [vmem:[#allocation7 + $0x5ac] ss:$16 sps:$4 sm:$0xff]  }
 0x181   :  { %2079 = vmatprep.subr.bf16.mxu0 %v5659_v57  ;;  %2251 = vmatprep.subr.bf16.mxu1 %v5662_v58  ;;  %v5719_v57 = vld [vmem:[#allocation7 + $0x404] ss:$16 sps:$4 sm:$0xff]   ;;  %v5722_v58 = vld [vmem:[#allocation7 + $0x40c] ss:$16 sps:$4 sm:$0xff]   ;;  %v5789_v47 = vld [vmem:[#allocation7 + $0x580] ss:$16 sps:$4 sm:$0xff]  }
 0x182   :  { %v5792_v50 = vld [vmem:[#allocation7 + $0x588] ss:$16 sps:$4 sm:$0xff]  }
 0x184   :  { %2080 = vmatpush1.bf16.msra.mxu0 %v5657_v59  ;;  %2252 = vmatpush1.bf16.msra.mxu1 %v5660_v60  ;;  %v6700_v59 = vpack.c.bf16 %v457_v54, %v449_v51  ;;  %v5717_v60 = vld [vmem:[#allocation7 + $0x400] ss:$16 sps:$4 sm:$0xff]   ;;  %v5797_v51 = vld [vmem:[#allocation7 + $0x5a4] ss:$16 sps:$4 sm:$0xff]  }
 0x185   :  { %2081 = vmatprep.subr.bf16.mxu0 %v5665_v61  ;;  %2253 = vmatprep.subr.bf16.mxu1 %v5668_v62  ;;  %v5720_v61 = vld [vmem:[#allocation7 + $0x408] ss:$16 sps:$4 sm:$0xff]   ;;  %v5725_v62 = vld [vmem:[#allocation7 + $0x424] ss:$16 sps:$4 sm:$0xff]   ;;  %v5795_v54 = vld [vmem:[#allocation7 + $0x5a0] ss:$16 sps:$4 sm:$0xff]  }
 0x188   :  { %2082 = vmatpush1.bf16.msra.mxu0 %v5663_v63  ;;  %2254 = vmatpush1.bf16.msra.mxu1 %v5666_v0  ;;  %v5728_v63 = vld [vmem:[#allocation7 + $0x42c] ss:$16 sps:$4 sm:$0xff]   ;;  %v5723_v0 = vld [vmem:[#allocation7 + $0x420] ss:$16 sps:$4 sm:$0xff]  }
 0x189   :  { %2083 = vmatprep.subr.bf16.mxu0 %v5671_v1  ;;  %2255 = vmatprep.subr.bf16.mxu1 %v5674_v2  ;;  %v5726_v1 = vld [vmem:[#allocation7 + $0x428] ss:$16 sps:$4 sm:$0xff]   ;;  %v5731_v2 = vld [vmem:[#allocation7 + $0x444] ss:$16 sps:$4 sm:$0xff]  }
 0x18c   :  { %2084 = vmatpush1.bf16.msra.mxu0 %v5669_v3  ;;  %2256 = vmatpush1.bf16.msra.mxu1 %v5672_v4  ;;  %v5734_v3 = vld [vmem:[#allocation7 + $0x44c] ss:$16 sps:$4 sm:$0xff]   ;;  %v5729_v4 = vld [vmem:[#allocation7 + $0x440] ss:$16 sps:$4 sm:$0xff]  }
 0x18d   :  { %2085 = vmatprep.subr.bf16.mxu0 %v5677_v5  ;;  %2257 = vmatprep.subr.bf16.mxu1 %v5680_v6  ;;  %v5732_v5 = vld [vmem:[#allocation7 + $0x448] ss:$16 sps:$4 sm:$0xff]   ;;  %v5737_v6 = vld [vmem:[#allocation7 + $0x464] ss:$16 sps:$4 sm:$0xff]  }
 0x190   :  { %2086 = vmatpush1.bf16.msra.mxu0 %v5675_v7  ;;  %2258 = vmatpush1.bf16.msra.mxu1 %v5678_v8  ;;  %v5735_v7 = vld [vmem:[#allocation7 + $0x460] ss:$16 sps:$4 sm:$0xff]   ;;  %v5738_v8 = vld [vmem:[#allocation7 + $0x468] ss:$16 sps:$4 sm:$0xff]  }
 0x191   :  { %2087 = vmatprep.subr.bf16.mxu0 %v5683_v9  ;;  %2259 = vmatprep.subr.bf16.mxu1 %v5686_v10  ;;  %v5743_v9 = vld [vmem:[#allocation7 + $0x484] ss:$16 sps:$4 sm:$0xff]   ;;  %v5746_v10 = vld [vmem:[#allocation7 + $0x48c] ss:$16 sps:$4 sm:$0xff]  }
 0x194   :  { %2088 = vmatpush1.bf16.msra.mxu0 %v5681_v11  ;;  %2260 = vmatpush1.bf16.msra.mxu1 %v5684_v12  ;;  %v5741_v11 = vld [vmem:[#allocation7 + $0x480] ss:$16 sps:$4 sm:$0xff]   ;;  %v5749_v12 = vld [vmem:[#allocation7 + $0x4a4] ss:$16 sps:$4 sm:$0xff]  }
 0x195   :  { %2089 = vmatprep.subr.bf16.mxu0 %v5689_v13  ;;  %2261 = vmatprep.subr.bf16.mxu1 %v5692_v14  ;;  %v5752_v13 = vld [vmem:[#allocation7 + $0x4ac] ss:$16 sps:$4 sm:$0xff]   ;;  %v5747_v14 = vld [vmem:[#allocation7 + $0x4a0] ss:$16 sps:$4 sm:$0xff]  }
 0x198   :  { %2090 = vmatpush1.bf16.msra.mxu0 %v5687_v15  ;;  %2262 = vmatpush1.bf16.msra.mxu1 %v5690_v16  ;;  %v5750_v15 = vld [vmem:[#allocation7 + $0x4a8] ss:$16 sps:$4 sm:$0xff]   ;;  %v5755_v16 = vld [vmem:[#allocation7 + $0x4c4] ss:$16 sps:$4 sm:$0xff]  }
 0x199   :  { %2091 = vmatprep.subr.bf16.mxu0 %v5695_v17  ;;  %2263 = vmatprep.subr.bf16.mxu1 %v5698_v18  ;;  %v5758_v17 = vld [vmem:[#allocation7 + $0x4cc] ss:$16 sps:$4 sm:$0xff]   ;;  %v5753_v18 = vld [vmem:[#allocation7 + $0x4c0] ss:$16 sps:$4 sm:$0xff]  }
 0x19c   :  { %2092 = vmatpush1.bf16.msra.mxu0 %v5693_v19  ;;  %2264 = vmatpush1.bf16.msra.mxu1 %v5696_v20  ;;  %v5756_v19 = vld [vmem:[#allocation7 + $0x4c8] ss:$16 sps:$4 sm:$0xff]   ;;  %v5761_v20 = vld [vmem:[#allocation7 + $0x4e4] ss:$16 sps:$4 sm:$0xff]  }
 0x19d   :  { %2093 = vmatprep.subr.bf16.mxu0 %v5701_v22  ;;  %2265 = vmatprep.subr.bf16.mxu1 %v5704_v23  ;;  %v5764_v22 = vld [vmem:[#allocation7 + $0x4ec] ss:$16 sps:$4 sm:$0xff]   ;;  %v5759_v23 = vld [vmem:[#allocation7 + $0x4e0] ss:$16 sps:$4 sm:$0xff]  }
 0x1a0   :  { %2094 = vmatpush1.bf16.msra.mxu0 %v5699_v24  ;;  %2266 = vmatpush1.bf16.msra.mxu1 %v5702_v25  ;;  %v5762_v24 = vld [vmem:[#allocation7 + $0x4e8] ss:$16 sps:$4 sm:$0xff]   ;;  %v5767_v25 = vld [vmem:[#allocation7 + $0x504] ss:$16 sps:$4 sm:$0xff]  }
 0x1a1   :  { %2095 = vmatprep.subr.bf16.mxu0 %v5707_v29  ;;  %2267 = vmatprep.subr.bf16.mxu1 %v5710_v30  ;;  %v5773_v29 = vld [vmem:[#allocation7 + $0x524] ss:$16 sps:$4 sm:$0xff]   ;;  %v5776_v30 = vld [vmem:[#allocation7 + $0x52c] ss:$16 sps:$4 sm:$0xff]  }
 0x1a4   :  { %2096 = vmatpush1.bf16.msra.mxu0 %v5705_v36  ;;  %2268 = vmatpush1.bf16.msra.mxu1 %v5708_v41  ;;  %v5780_v36 = vld [vmem:[#allocation7 + $0x548] ss:$16 sps:$4 sm:$0xff]   ;;  %v5785_v41 = vld [vmem:[#allocation7 + $0x564] ss:$16 sps:$4 sm:$0xff]  }
 0x1a5   :  { %2097 = vmatprep.subr.bf16.mxu0 %v5713_v37  ;;  %2269 = vmatprep.subr.bf16.mxu1 %v5716_v45  ;;  %v5791_v37 = vld [vmem:[#allocation7 + $0x584] ss:$16 sps:$4 sm:$0xff]   ;;  %v5794_v45 = vld [vmem:[#allocation7 + $0x58c] ss:$16 sps:$4 sm:$0xff]  }
 0x1a8   :  { %2098 = vmatpush1.bf16.msra.mxu0 %v5711_v38  ;;  %2270 = vmatpush1.bf16.msra.mxu1 %v5714_v55  ;;  %v5798_v38 = vld [vmem:[#allocation7 + $0x5a8] ss:$16 sps:$4 sm:$0xff]   ;;  %v5803_v55 = vld [vmem:[#allocation7 + $0x5c4] ss:$16 sps:$4 sm:$0xff]  }
 0x1a9   :  { %2110 = vmatprep.subr.bf16.mxu0 %v5719_v57  ;;  %2282 = vmatprep.subr.bf16.mxu1 %v5722_v58  ;;  %v5806_v57 = vld [vmem:[#allocation7 + $0x5cc] ss:$16 sps:$4 sm:$0xff]   ;;  %v5801_v58 = vld [vmem:[#allocation7 + $0x5c0] ss:$16 sps:$4 sm:$0xff]  }
 0x1ab   :  { %2100 = vmatmul.mubr.bf16.vlgmr.msra.gmra.mrb[0].mxu0 %v6688_v21  ;;  %2272 = vmatmul.mubr.bf16.vlgmr.msra.gmra.mrb[16].mxu1 %v6688_v21  ;;  %v5740_v21 = vld [vmem:[#allocation7 + $0x46c] ss:$16 sps:$4 sm:$0xff]  }
 0x1ac   :  { %2111 = vmatpush1.bf16.msra.mxu0 %v5717_v60  ;;  %2283 = vmatpush1.bf16.msra.mxu1 %v5720_v61  ;;  %v5804_v60 = vld [vmem:[#allocation7 + $0x5c8] ss:$16 sps:$4 sm:$0xff]   ;;  %v5809_v61 = vld [vmem:[#allocation7 + $0x5e4] ss:$16 sps:$4 sm:$0xff]  }
 0x1ad   :  { %2112 = vmatprep.subr.bf16.mxu0 %v5725_v62  ;;  %2284 = vmatprep.subr.bf16.mxu1 %v5728_v63  ;;  %v5812_v62 = vld [vmem:[#allocation7 + $0x5ec] ss:$16 sps:$4 sm:$0xff]   ;;  %v5807_v63 = vld [vmem:[#allocation7 + $0x5e0] ss:$16 sps:$4 sm:$0xff]  }
 0x1ae   :  { %2142 = vmatprep.mubr.bf16.mxu0 %v6692_v52  ;;  %2314 = vmatprep.mubr.bf16.mxu1 %v6692_v52  ;;  %v5744_v52 = vld [vmem:[#allocation7 + $0x488] ss:$16 sps:$4 sm:$0xff]  }
 0x1b0   :  { %2113 = vmatpush1.bf16.msra.mxu0 %v5723_v0  ;;  %2285 = vmatpush1.bf16.msra.mxu1 %v5726_v1  ;;  %v5810_v0 = vld [vmem:[#allocation7 + $0x5e8] ss:$16 sps:$4 sm:$0xff]   ;;  %v5815_v1 = vld [vmem:[#allocation7 + $0x604] ss:$16 sps:$4 sm:$0xff]  }
 0x1b1   :  { %2114 = vmatprep.subr.bf16.mxu0 %v5731_v2  ;;  %2286 = vmatprep.subr.bf16.mxu1 %v5734_v3  ;;  %v5818_v2 = vld [vmem:[#allocation7 + $0x60c] ss:$16 sps:$4 sm:$0xff]   ;;  %v5813_v3 = vld [vmem:[#allocation7 + $0x600] ss:$16 sps:$4 sm:$0xff]  }
 0x1b4   :  { %2115 = vmatpush1.bf16.msra.mxu0 %v5729_v4  ;;  %2287 = vmatpush1.bf16.msra.mxu1 %v5732_v5  ;;  %v5816_v4 = vld [vmem:[#allocation7 + $0x608] ss:$16 sps:$4 sm:$0xff]   ;;  %v5821_v5 = vld [vmem:[#allocation7 + $0x624] ss:$16 sps:$4 sm:$0xff]  }
 0x1b5   :  { %2116 = vmatprep.subr.bf16.mxu0 %v5737_v6  ;;  %2288 = vmatprep.subr.bf16.mxu1 %v5740_v21  ;;  %v5824_v6 = vld [vmem:[#allocation7 + $0x62c] ss:$16 sps:$4 sm:$0xff]   ;;  %v5819_v21 = vld [vmem:[#allocation7 + $0x620] ss:$16 sps:$4 sm:$0xff]  }
 0x1b8   :  { %2117 = vmatpush1.bf16.msra.mxu0 %v5735_v7  ;;  %2289 = vmatpush1.bf16.msra.mxu1 %v5738_v8  ;;  %v5822_v7 = vld [vmem:[#allocation7 + $0x628] ss:$16 sps:$4 sm:$0xff]   ;;  %v5827_v8 = vld [vmem:[#allocation7 + $0x644] ss:$16 sps:$4 sm:$0xff]  }
 0x1b9   :  { %2118 = vmatprep.subr.bf16.mxu0 %v5743_v9  ;;  %2290 = vmatprep.subr.bf16.mxu1 %v5746_v10  ;;  %v5830_v9 = vld [vmem:[#allocation7 + $0x64c] ss:$16 sps:$4 sm:$0xff]   ;;  %v5825_v10 = vld [vmem:[#allocation7 + $0x640] ss:$16 sps:$4 sm:$0xff]  }
 0x1bc   :  { %2119 = vmatpush1.bf16.msra.mxu0 %v5741_v11  ;;  %2291 = vmatpush1.bf16.msra.mxu1 %v5744_v52  ;;  %v5828_v11 = vld [vmem:[#allocation7 + $0x648] ss:$16 sps:$4 sm:$0xff]   ;;  %v5833_v52 = vld [vmem:[#allocation7 + $0x664] ss:$16 sps:$4 sm:$0xff]  }
 0x1bd   :  { %2120 = vmatprep.subr.bf16.mxu0 %v5749_v12  ;;  %2292 = vmatprep.subr.bf16.mxu1 %v5752_v13  ;;  %v5831_v12 = vld [vmem:[#allocation7 + $0x660] ss:$16 sps:$4 sm:$0xff]   ;;  %v5834_v13 = vld [vmem:[#allocation7 + $0x668] ss:$16 sps:$4 sm:$0xff]  }
 0x1c0   :  { %2121 = vmatpush1.bf16.msra.mxu0 %v5747_v14  ;;  %2293 = vmatpush1.bf16.msra.mxu1 %v5750_v15  ;;  %v5839_v14 = vld [vmem:[#allocation7 + $0x684] ss:$16 sps:$4 sm:$0xff]   ;;  %v5842_v15 = vld [vmem:[#allocation7 + $0x68c] ss:$16 sps:$4 sm:$0xff]  }
 0x1c1   :  { %2122 = vmatprep.subr.bf16.mxu0 %v5755_v16  ;;  %2294 = vmatprep.subr.bf16.mxu1 %v5758_v17  ;;  %v5837_v16 = vld [vmem:[#allocation7 + $0x680] ss:$16 sps:$4 sm:$0xff]   ;;  %v5845_v17 = vld [vmem:[#allocation7 + $0x6a4] ss:$16 sps:$4 sm:$0xff]  }
 0x1c4   :  { %2123 = vmatpush1.bf16.msra.mxu0 %v5753_v18  ;;  %2295 = vmatpush1.bf16.msra.mxu1 %v5756_v19  ;;  %v5848_v18 = vld [vmem:[#allocation7 + $0x6ac] ss:$16 sps:$4 sm:$0xff]   ;;  %v5843_v19 = vld [vmem:[#allocation7 + $0x6a0] ss:$16 sps:$4 sm:$0xff]  }
 0x1c5   :  { %2124 = vmatprep.subr.bf16.mxu0 %v5761_v20  ;;  %2296 = vmatprep.subr.bf16.mxu1 %v5764_v22  ;;  %v5846_v20 = vld [vmem:[#allocation7 + $0x6a8] ss:$16 sps:$4 sm:$0xff]   ;;  %v5851_v22 = vld [vmem:[#allocation7 + $0x6c4] ss:$16 sps:$4 sm:$0xff]  }
 0x1c8   :  { %2125 = vmatpush1.bf16.msra.mxu0 %v5759_v23  ;;  %2297 = vmatpush1.bf16.msra.mxu1 %v5762_v24  ;;  %v5854_v23 = vld [vmem:[#allocation7 + $0x6cc] ss:$16 sps:$4 sm:$0xff]   ;;  %v5849_v24 = vld [vmem:[#allocation7 + $0x6c0] ss:$16 sps:$4 sm:$0xff]  }
 0x1c9   :  { %2126 = vmatprep.subr.bf16.mxu0 %v5767_v25  ;;  %2298 = vmatprep.subr.bf16.mxu1 %v5770_v26  ;;  %v5852_v25 = vld [vmem:[#allocation7 + $0x6c8] ss:$16 sps:$4 sm:$0xff]   ;;  %v5857_v26 = vld [vmem:[#allocation7 + $0x6e4] ss:$16 sps:$4 sm:$0xff]  }
 0x1cc   :  { %2127 = vmatpush1.bf16.msra.mxu0 %v5765_v27  ;;  %2299 = vmatpush1.bf16.msra.mxu1 %v5768_v28  ;;  %v5860_v27 = vld [vmem:[#allocation7 + $0x6ec] ss:$16 sps:$4 sm:$0xff]   ;;  %v5855_v28 = vld [vmem:[#allocation7 + $0x6e0] ss:$16 sps:$4 sm:$0xff]  }
 0x1cd   :  { %2128 = vmatprep.subr.bf16.mxu0 %v5773_v29  ;;  %2300 = vmatprep.subr.bf16.mxu1 %v5776_v30  ;;  %v5858_v29 = vld [vmem:[#allocation7 + $0x6e8] ss:$16 sps:$4 sm:$0xff]   ;;  %v5863_v30 = vld [vmem:[#allocation7 + $0x704] ss:$16 sps:$4 sm:$0xff]  }
 0x1d0   :  { %2129 = vmatpush1.bf16.msra.mxu0 %v5771_v31  ;;  %2301 = vmatpush1.bf16.msra.mxu1 %v5774_v32  ;;  %v5866_v31 = vld [vmem:[#allocation7 + $0x70c] ss:$16 sps:$4 sm:$0xff]   ;;  %v5861_v32 = vld [vmem:[#allocation7 + $0x700] ss:$16 sps:$4 sm:$0xff]  }
 0x1d1   :  { %2130 = vmatprep.subr.bf16.mxu0 %v5779_v33  ;;  %2302 = vmatprep.subr.bf16.mxu1 %v5782_v34  ;;  %v5864_v33 = vld [vmem:[#allocation7 + $0x708] ss:$16 sps:$4 sm:$0xff]   ;;  %v5869_v34 = vld [vmem:[#allocation7 + $0x724] ss:$16 sps:$4 sm:$0xff]  }
 0x1d4   :  { %2131 = vmatpush1.bf16.msra.mxu0 %v5777_v35  ;;  %2303 = vmatpush1.bf16.msra.mxu1 %v5780_v36  ;;  %v5872_v35 = vld [vmem:[#allocation7 + $0x72c] ss:$16 sps:$4 sm:$0xff]   ;;  %v5867_v36 = vld [vmem:[#allocation7 + $0x720] ss:$16 sps:$4 sm:$0xff]  }
 0x1d5   :  { %2132 = vmatprep.subr.bf16.mxu0 %v5785_v41  ;;  %2304 = vmatprep.subr.bf16.mxu1 %v5788_v42  ;;  %v5870_v41 = vld [vmem:[#allocation7 + $0x728] ss:$16 sps:$4 sm:$0xff]   ;;  %v5875_v42 = vld [vmem:[#allocation7 + $0x744] ss:$16 sps:$4 sm:$0xff]  }
 0x1d8   :  { %2133 = vmatpush1.bf16.msra.mxu0 %v5783_v43  ;;  %2305 = vmatpush1.bf16.msra.mxu1 %v5786_v44  ;;  %v5878_v43 = vld [vmem:[#allocation7 + $0x74c] ss:$16 sps:$4 sm:$0xff]   ;;  %v5873_v44 = vld [vmem:[#allocation7 + $0x740] ss:$16 sps:$4 sm:$0xff]  }
 0x1d9   :  { %2134 = vmatprep.subr.bf16.mxu0 %v5791_v37  ;;  %2306 = vmatprep.subr.bf16.mxu1 %v5794_v45  ;;  %v5876_v37 = vld [vmem:[#allocation7 + $0x748] ss:$16 sps:$4 sm:$0xff]   ;;  %v5881_v45 = vld [vmem:[#allocation7 + $0x764] ss:$16 sps:$4 sm:$0xff]  }
 0x1dc   :  { %2135 = vmatpush1.bf16.msra.mxu0 %v5789_v47  ;;  %2307 = vmatpush1.bf16.msra.mxu1 %v5792_v50  ;;  %v5884_v47 = vld [vmem:[#allocation7 + $0x76c] ss:$16 sps:$4 sm:$0xff]   ;;  %v5879_v50 = vld [vmem:[#allocation7 + $0x760] ss:$16 sps:$4 sm:$0xff]  }
 0x1dd   :  { %2136 = vmatprep.subr.bf16.mxu0 %v5797_v51  ;;  %2308 = vmatprep.subr.bf16.mxu1 %v5800_v53  ;;  %v5882_v51 = vld [vmem:[#allocation7 + $0x768] ss:$16 sps:$4 sm:$0xff]   ;;  %v5887_v53 = vld [vmem:[#allocation7 + $0x784] ss:$16 sps:$4 sm:$0xff]  }
 0x1e0   :  { %2137 = vmatpush1.bf16.msra.mxu0 %v5795_v54  ;;  %2309 = vmatpush1.bf16.msra.mxu1 %v5798_v38  ;;  %v5890_v54 = vld [vmem:[#allocation7 + $0x78c] ss:$16 sps:$4 sm:$0xff]   ;;  %v5885_v38 = vld [vmem:[#allocation7 + $0x780] ss:$16 sps:$4 sm:$0xff]  }
 0x1e1   :  { %2138 = vmatprep.subr.bf16.mxu0 %v5803_v55  ;;  %2310 = vmatprep.subr.bf16.mxu1 %v5806_v57  ;;  %v5888_v55 = vld [vmem:[#allocation7 + $0x788] ss:$16 sps:$4 sm:$0xff]   ;;  %v5893_v57 = vld [vmem:[#allocation7 + $0x7a4] ss:$16 sps:$4 sm:$0xff]  }
 0x1e4   :  { %2139 = vmatpush1.bf16.msra.mxu0 %v5801_v58  ;;  %2311 = vmatpush1.bf16.msra.mxu1 %v5804_v60  ;;  %v5896_v58 = vld [vmem:[#allocation7 + $0x7ac] ss:$16 sps:$4 sm:$0xff]   ;;  %v5891_v60 = vld [vmem:[#allocation7 + $0x7a0] ss:$16 sps:$4 sm:$0xff]  }
 0x1e5   :  { %2140 = vmatprep.subr.bf16.mxu0 %v5809_v61  ;;  %2312 = vmatprep.subr.bf16.mxu1 %v5812_v62  ;;  %v5894_v61 = vld [vmem:[#allocation7 + $0x7a8] ss:$16 sps:$4 sm:$0xff]   ;;  %v5899_v62 = vld [vmem:[#allocation7 + $0x7c4] ss:$16 sps:$4 sm:$0xff]  }
 0x1e8   :  { %2141 = vmatpush1.bf16.msra.mxu0 %v5807_v63  ;;  %2313 = vmatpush1.bf16.msra.mxu1 %v5810_v0  ;;  %v5902_v63 = vld [vmem:[#allocation7 + $0x7cc] ss:$16 sps:$4 sm:$0xff]   ;;  %v5897_v0 = vld [vmem:[#allocation7 + $0x7c0] ss:$16 sps:$4 sm:$0xff]  }
 0x1e9   :  { %2153 = vmatprep.subr.bf16.mxu0 %v5815_v1  ;;  %2325 = vmatprep.subr.bf16.mxu1 %v5818_v2  ;;  %v5900_v1 = vld [vmem:[#allocation7 + $0x7c8] ss:$16 sps:$4 sm:$0xff]   ;;  %v5905_v2 = vld [vmem:[#allocation7 + $0x7e4] ss:$16 sps:$4 sm:$0xff]  }
 0x1eb   :  { %2143 = vmatmul.mubr.bf16.vlgmr.msra.gmra.mrb[0].mxu0 %v6690_v48  ;;  %2315 = vmatmul.mubr.bf16.vlgmr.msra.gmra.mrb[16].mxu1 %v6690_v48  ;;  %v5836_v48 = vld [vmem:[#allocation7 + $0x66c] ss:$16 sps:$4 sm:$0xff]  }
 0x1ec   :  { %2154 = vmatpush1.bf16.msra.mxu0 %v5813_v3  ;;  %2326 = vmatpush1.bf16.msra.mxu1 %v5816_v4  ;;  %v5908_v3 = vld [vmem:[#allocation7 + $0x7ec] ss:$16 sps:$4 sm:$0xff]   ;;  %v5903_v4 = vld [vmem:[#allocation7 + $0x7e0] ss:$16 sps:$4 sm:$0xff]  }
 0x1ed   :  { %2155 = vmatprep.subr.bf16.mxu0 %v5821_v5  ;;  %2327 = vmatprep.subr.bf16.mxu1 %v5824_v6  ;;  %v5906_v5 = vld [vmem:[#allocation7 + $0x7e8] ss:$16 sps:$4 sm:$0xff]   ;;  %v5911_v6 = vld [vmem:[#allocation8 + $0x4] ss:$24 sps:$4 sm:$0xff]  }
 0x1ee   :  { %2185 = vmatprep.mubr.bf16.mxu0 %v6700_v59  ;;  %2357 = vmatprep.mubr.bf16.mxu1 %v6700_v59  ;;  %v5840_v59 = vld [vmem:[#allocation7 + $0x688] ss:$16 sps:$4 sm:$0xff]  }
 0x1f0   :  { %2156 = vmatpush1.bf16.msra.mxu0 %v5819_v21  ;;  %2328 = vmatpush1.bf16.msra.mxu1 %v5822_v7  ;;  %v5914_v21 = vld [vmem:[#allocation8 + $0xc] ss:$24 sps:$4 sm:$0xff]   ;;  %v5909_v7 = vld [vmem:[#allocation8] ss:$24 sps:$4 sm:$0xff]  }
 0x1f1   :  { %2157 = vmatprep.subr.bf16.mxu0 %v5827_v8  ;;  %2329 = vmatprep.subr.bf16.mxu1 %v5830_v9  ;;  %v5912_v8 = vld [vmem:[#allocation8 + $0x8] ss:$24 sps:$4 sm:$0xff]   ;;  %v5917_v9 = vld [vmem:[#allocation8 + $0x34] ss:$24 sps:$4 sm:$0xff]  }
 0x1f4   :  { %2158 = vmatpush1.bf16.msra.mxu0 %v5825_v10  ;;  %2330 = vmatpush1.bf16.msra.mxu1 %v5828_v11  ;;  %v5920_v10 = vld [vmem:[#allocation8 + $0x3c] ss:$24 sps:$4 sm:$0xff]   ;;  %v5915_v11 = vld [vmem:[#allocation8 + $0x30] ss:$24 sps:$4 sm:$0xff]  }
 0x1f5   :  { %2159 = vmatprep.subr.bf16.mxu0 %v5833_v52  ;;  %2331 = vmatprep.subr.bf16.mxu1 %v5836_v48  ;;  %v5918_v52 = vld [vmem:[#allocation8 + $0x38] ss:$24 sps:$4 sm:$0xff]   ;;  %v5923_v48 = vld [vmem:[#allocation8 + $0x64] ss:$24 sps:$4 sm:$0xff]  }
 0x1f8   :  { %2160 = vmatpush1.bf16.msra.mxu0 %v5831_v12  ;;  %2332 = vmatpush1.bf16.msra.mxu1 %v5834_v13  ;;  %v5926_v12 = vld [vmem:[#allocation8 + $0x6c] ss:$24 sps:$4 sm:$0xff]   ;;  %v5921_v13 = vld [vmem:[#allocation8 + $0x60] ss:$24 sps:$4 sm:$0xff]  }
 0x1f9   :  { %2161 = vmatprep.subr.bf16.mxu0 %v5839_v14  ;;  %2333 = vmatprep.subr.bf16.mxu1 %v5842_v15  ;;  %v5924_v14 = vld [vmem:[#allocation8 + $0x68] ss:$24 sps:$4 sm:$0xff]   ;;  %v5929_v15 = vld [vmem:[#allocation8 + $0x94] ss:$24 sps:$4 sm:$0xff]  }
 0x1fc   :  { %2162 = vmatpush1.bf16.msra.mxu0 %v5837_v16  ;;  %2334 = vmatpush1.bf16.msra.mxu1 %v5840_v59  ;;  %v5932_v16 = vld [vmem:[#allocation8 + $0x9c] ss:$24 sps:$4 sm:$0xff]   ;;  %v5927_v59 = vld [vmem:[#allocation8 + $0x90] ss:$24 sps:$4 sm:$0xff]  }
 0x1fd   :  { %2163 = vmatprep.subr.bf16.mxu0 %v5845_v17  ;;  %2335 = vmatprep.subr.bf16.mxu1 %v5848_v18  ;;  %v5935_v17 = vld [vmem:[#allocation8 + $0xc4] ss:$24 sps:$4 sm:$0xff]  }
 0x1fe   :  { %v5938_v18 = vld [vmem:[#allocation8 + $0xcc] ss:$24 sps:$4 sm:$0xff]  }
 0x200   :  { %2164 = vmatpush1.bf16.msra.mxu0 %v5843_v19  ;;  %2336 = vmatpush1.bf16.msra.mxu1 %v5846_v20  ;;  %v5933_v19 = vld [vmem:[#allocation8 + $0xc0] ss:$24 sps:$4 sm:$0xff]  }
 0x201   :  { %2165 = vmatprep.subr.bf16.mxu0 %v5851_v22  ;;  %2337 = vmatprep.subr.bf16.mxu1 %v5854_v23  ;;  %v5936_v20 = vld [vmem:[#allocation8 + $0xc8] ss:$24 sps:$4 sm:$0xff]   ;;  %v5941_v22 = vld [vmem:[#allocation8 + $0xf4] ss:$24 sps:$4 sm:$0xff]  }
 0x202   :  { %v5944_v23 = vld [vmem:[#allocation8 + $0xfc] ss:$24 sps:$4 sm:$0xff]  }
 0x204   :  { %2166 = vmatpush1.bf16.msra.mxu0 %v5849_v24  ;;  %2338 = vmatpush1.bf16.msra.mxu1 %v5852_v25  ;;  %v5939_v24 = vld [vmem:[#allocation8 + $0xf0] ss:$24 sps:$4 sm:$0xff]  }
 0x205   :  { %2167 = vmatprep.subr.bf16.mxu0 %v5857_v26  ;;  %2339 = vmatprep.subr.bf16.mxu1 %v5860_v27  ;;  %v5942_v25 = vld [vmem:[#allocation8 + $0xf8] ss:$24 sps:$4 sm:$0xff]   ;;  %v5947_v26 = vld [vmem:[#allocation8 + $0x124] ss:$24 sps:$4 sm:$0xff]  }
 0x206   :  { %v5950_v27 = vld [vmem:[#allocation8 + $0x12c] ss:$24 sps:$4 sm:$0xff]  }
 0x208   :  { %2168 = vmatpush1.bf16.msra.mxu0 %v5855_v28  ;;  %2340 = vmatpush1.bf16.msra.mxu1 %v5858_v29  ;;  %v5945_v28 = vld [vmem:[#allocation8 + $0x120] ss:$24 sps:$4 sm:$0xff]  }
 0x209   :  { %2169 = vmatprep.subr.bf16.mxu0 %v5863_v30  ;;  %2341 = vmatprep.subr.bf16.mxu1 %v5866_v31  ;;  %v5948_v29 = vld [vmem:[#allocation8 + $0x128] ss:$24 sps:$4 sm:$0xff]   ;;  %v5953_v30 = vld [vmem:[#allocation8 + $0x154] ss:$24 sps:$4 sm:$0xff]  }
 0x20a   :  { %v5956_v31 = vld [vmem:[#allocation8 + $0x15c] ss:$24 sps:$4 sm:$0xff]  }
 0x20c   :  { %2170 = vmatpush1.bf16.msra.mxu0 %v5861_v32  ;;  %2342 = vmatpush1.bf16.msra.mxu1 %v5864_v33  ;;  %v5951_v32 = vld [vmem:[#allocation8 + $0x150] ss:$24 sps:$4 sm:$0xff]  }
 0x20d   :  { %2171 = vmatprep.subr.bf16.mxu0 %v5869_v34  ;;  %2343 = vmatprep.subr.bf16.mxu1 %v5872_v35  ;;  %v5954_v33 = vld [vmem:[#allocation8 + $0x158] ss:$24 sps:$4 sm:$0xff]   ;;  %v5959_v34 = vld [vmem:[#allocation8 + $0x184] ss:$24 sps:$4 sm:$0xff]  }
 0x20e   :  { %v5962_v35 = vld [vmem:[#allocation8 + $0x18c] ss:$24 sps:$4 sm:$0xff]  }
 0x210   :  { %2172 = vmatpush1.bf16.msra.mxu0 %v5867_v36  ;;  %2344 = vmatpush1.bf16.msra.mxu1 %v5870_v41  ;;  %v5957_v36 = vld [vmem:[#allocation8 + $0x180] ss:$24 sps:$4 sm:$0xff]  }
 0x211   :  { %2173 = vmatprep.subr.bf16.mxu0 %v5875_v42  ;;  %2345 = vmatprep.subr.bf16.mxu1 %v5878_v43  ;;  %v5960_v41 = vld [vmem:[#allocation8 + $0x188] ss:$24 sps:$4 sm:$0xff]   ;;  %v5965_v42 = vld [vmem:[#allocation8 + $0x1b4] ss:$24 sps:$4 sm:$0xff]  }
 0x212   :  { %v5968_v43 = vld [vmem:[#allocation8 + $0x1bc] ss:$24 sps:$4 sm:$0xff]  }
 0x214   :  { %2174 = vmatpush1.bf16.msra.mxu0 %v5873_v44  ;;  %2346 = vmatpush1.bf16.msra.mxu1 %v5876_v37  ;;  %v5963_v44 = vld [vmem:[#allocation8 + $0x1b0] ss:$24 sps:$4 sm:$0xff]  }
 0x215   :  { %2175 = vmatprep.subr.bf16.mxu0 %v5881_v45  ;;  %2347 = vmatprep.subr.bf16.mxu1 %v5884_v47  ;;  %v5966_v37 = vld [vmem:[#allocation8 + $0x1b8] ss:$24 sps:$4 sm:$0xff]   ;;  %v5971_v45 = vld [vmem:[#allocation8 + $0x1e4] ss:$24 sps:$4 sm:$0xff]  }
 0x216   :  { %v5974_v47 = vld [vmem:[#allocation8 + $0x1ec] ss:$24 sps:$4 sm:$0xff]  }
 0x218   :  { %2176 = vmatpush1.bf16.msra.mxu0 %v5879_v50  ;;  %2348 = vmatpush1.bf16.msra.mxu1 %v5882_v51  ;;  %v5969_v50 = vld [vmem:[#allocation8 + $0x1e0] ss:$24 sps:$4 sm:$0xff]  }
 0x219   :  { %2177 = vmatprep.subr.bf16.mxu0 %v5887_v53  ;;  %2349 = vmatprep.subr.bf16.mxu1 %v5890_v54  ;;  %v5972_v51 = vld [vmem:[#allocation8 + $0x1e8] ss:$24 sps:$4 sm:$0xff]   ;;  %v5977_v53 = vld [vmem:[#allocation8 + $0x214] ss:$24 sps:$4 sm:$0xff]  }
 0x21a   :  { %v5980_v54 = vld [vmem:[#allocation8 + $0x21c] ss:$24 sps:$4 sm:$0xff]  }
 0x21c   :  { %2178 = vmatpush1.bf16.msra.mxu0 %v5885_v38  ;;  %2350 = vmatpush1.bf16.msra.mxu1 %v5888_v55  ;;  %v5975_v38 = vld [vmem:[#allocation8 + $0x210] ss:$24 sps:$4 sm:$0xff]  }
 0x21d   :  { %2179 = vmatprep.subr.bf16.mxu0 %v5893_v57  ;;  %2351 = vmatprep.subr.bf16.mxu1 %v5896_v58  ;;  %v5978_v55 = vld [vmem:[#allocation8 + $0x218] ss:$24 sps:$4 sm:$0xff]   ;;  %v5983_v57 = vld [vmem:[#allocation8 + $0x244] ss:$24 sps:$4 sm:$0xff]  }
 0x21e   :  { %v5986_v58 = vld [vmem:[#allocation8 + $0x24c] ss:$24 sps:$4 sm:$0xff]  }
 0x220   :  { %2180 = vmatpush1.bf16.msra.mxu0 %v5891_v60  ;;  %2352 = vmatpush1.bf16.msra.mxu1 %v5894_v61  ;;  %v5981_v60 = vld [vmem:[#allocation8 + $0x240] ss:$24 sps:$4 sm:$0xff]  }
 0x221   :  { %2181 = vmatprep.subr.bf16.mxu0 %v5899_v62  ;;  %2353 = vmatprep.subr.bf16.mxu1 %v5902_v63  ;;  %v5984_v61 = vld [vmem:[#allocation8 + $0x248] ss:$24 sps:$4 sm:$0xff]   ;;  %v5989_v62 = vld [vmem:[#allocation8 + $0x274] ss:$24 sps:$4 sm:$0xff]  }
 0x222   :  { %v5992_v63 = vld [vmem:[#allocation8 + $0x27c] ss:$24 sps:$4 sm:$0xff]  }
 0x224   :  { %2182 = vmatpush1.bf16.msra.mxu0 %v5897_v0  ;;  %2354 = vmatpush1.bf16.msra.mxu1 %v5900_v1  ;;  %v5987_v0 = vld [vmem:[#allocation8 + $0x270] ss:$24 sps:$4 sm:$0xff]  }
 0x225   :  { %2183 = vmatprep.subr.bf16.mxu0 %v5905_v2  ;;  %2355 = vmatprep.subr.bf16.mxu1 %v5908_v3  ;;  %v5990_v1 = vld [vmem:[#allocation8 + $0x278] ss:$24 sps:$4 sm:$0xff]   ;;  %v5995_v2 = vld [vmem:[#allocation8 + $0x2a4] ss:$24 sps:$4 sm:$0xff]  }
 0x226   :  { %v5998_v3 = vld [vmem:[#allocation8 + $0x2ac] ss:$24 sps:$4 sm:$0xff]  }
 0x228   :  { %2184 = vmatpush1.bf16.msra.mxu0 %v5903_v4  ;;  %2356 = vmatpush1.bf16.msra.mxu1 %v5906_v5  ;;  %v5993_v4 = vld [vmem:[#allocation8 + $0x2a0] ss:$24 sps:$4 sm:$0xff]  }
 0x229   :  { %3170 = vmatprep.subr.bf16.mxu0 %v5911_v6  ;;  %3256 = vmatprep.subr.bf16.mxu1 %v5914_v21  ;;  %v5996_v5 = vld [vmem:[#allocation8 + $0x2a8] ss:$24 sps:$4 sm:$0xff]   ;;  %v6001_v6 = vld [vmem:[#allocation8 + $0x2d4] ss:$24 sps:$4 sm:$0xff]  }
 0x22a   :  { %v6004_v21 = vld [vmem:[#allocation8 + $0x2dc] ss:$24 sps:$4 sm:$0xff]  }
 0x22b   :  { %2186 = vmatmul.mubr.bf16.vlgmr.msra.gmra.mrb[0].mxu0 %v6698_v56  ;;  %2358 = vmatmul.mubr.bf16.vlgmr.msra.gmra.mrb[16].mxu1 %v6698_v56  ;;  %v5930_v56 = vld [vmem:[#allocation8 + $0x98] ss:$24 sps:$4 sm:$0xff]  }
 0x22c   :  { %3171 = vmatpush1.bf16.msra.mxu0 %v5909_v7  ;;  %3257 = vmatpush1.bf16.msra.mxu1 %v5912_v8  ;;  %v5999_v7 = vld [vmem:[#allocation8 + $0x2d0] ss:$24 sps:$4 sm:$0xff]  }
 0x22d   :  { %3172 = vmatprep.subr.bf16.mxu0 %v5917_v9  ;;  %3258 = vmatprep.subr.bf16.mxu1 %v5920_v10  ;;  %v6002_v8 = vld [vmem:[#allocation8 + $0x2d8] ss:$24 sps:$4 sm:$0xff]   ;;  %v6007_v9 = vld [vmem:[#allocation8 + $0x304] ss:$24 sps:$4 sm:$0xff]  }
 0x22e   :  { %v6010_v10 = vld [vmem:[#allocation8 + $0x30c] ss:$24 sps:$4 sm:$0xff]  }
 0x230   :  { %3173 = vmatpush1.bf16.msra.mxu0 %v5915_v11  ;;  %3259 = vmatpush1.bf16.msra.mxu1 %v5918_v52  ;;  %v722_v11 = vld [vmem:[#allocation13 + $0x8] sm:$0xf] }
 0x231   :  { %3174 = vmatprep.subr.bf16.mxu0 %v5923_v48  ;;  %3260 = vmatprep.subr.bf16.mxu1 %v5926_v12  ;;  %v727_v52 = vrot.slane %v722_v11, %v6665_v39  ;;  %v735_v48 = vrot.slane %v722_v11, %v6675_v46  ;;  %v731_v12 = vrot.slane %v722_v11, %v6668_v40 }
 0x234   :  { %3175 = vmatpush1.bf16.msra.mxu0 %v5921_v13  ;;  %3261 = vmatpush1.bf16.msra.mxu1 %v5924_v14  ;;  %v739_v13 = vrot.slane %v722_v11, %v6678_v49  ;;  %v6052_v11 = vld [vmem:[#allocation8 + $0x45c] ss:$24 sps:$4 sm:$0xff]  }
 0x235   :  { %3176 = vmatprep.subr.bf16.mxu0 %v5929_v15  ;;  %3262 = vmatprep.subr.bf16.mxu1 %v5932_v16 }
 0x238   :  { %3177 = vmatpush1.bf16.msra.mxu0 %v5927_v59  ;;  %3263 = vmatpush1.bf16.msra.mxu1 %v5930_v56 }
 0x239   :  { %3178 = vmatprep.subr.bf16.mxu0 %v5935_v17  ;;  %3264 = vmatprep.subr.bf16.mxu1 %v5938_v18 }
 0x23c   :  { %3179 = vmatpush1.bf16.msra.mxu0 %v5933_v19  ;;  %3265 = vmatpush1.bf16.msra.mxu1 %v5936_v20 }
 0x23d   :  { %3180 = vmatprep.subr.bf16.mxu0 %v5941_v22  ;;  %3266 = vmatprep.subr.bf16.mxu1 %v5944_v23 }
 0x240   :  { %3181 = vmatpush1.bf16.msra.mxu0 %v5939_v24  ;;  %3267 = vmatpush1.bf16.msra.mxu1 %v5942_v25 }
 0x241   :  { %3182 = vmatprep.subr.bf16.mxu0 %v5947_v26  ;;  %3268 = vmatprep.subr.bf16.mxu1 %v5950_v27 }
 0x244   :  { %3183 = vmatpush1.bf16.msra.mxu0 %v5945_v28  ;;  %3269 = vmatpush1.bf16.msra.mxu1 %v5948_v29 }
 0x245   :  { %3184 = vmatprep.subr.bf16.mxu0 %v5953_v30  ;;  %3270 = vmatprep.subr.bf16.mxu1 %v5956_v31 }
 0x248   :  { %3185 = vmatpush1.bf16.msra.mxu0 %v5951_v32  ;;  %3271 = vmatpush1.bf16.msra.mxu1 %v5954_v33 }
 0x249   :  { %3186 = vmatprep.subr.bf16.mxu0 %v5959_v34  ;;  %3272 = vmatprep.subr.bf16.mxu1 %v5962_v35 }
 0x24c   :  { %3187 = vmatpush1.bf16.msra.mxu0 %v5957_v36  ;;  %3273 = vmatpush1.bf16.msra.mxu1 %v5960_v41 }
 0x24d   :  { %3188 = vmatprep.subr.bf16.mxu0 %v5965_v42  ;;  %3274 = vmatprep.subr.bf16.mxu1 %v5968_v43 }
 0x250   :  { %3189 = vmatpush1.bf16.msra.mxu0 %v5963_v44  ;;  %3275 = vmatpush1.bf16.msra.mxu1 %v5966_v37  ;;  %v6005_v37 = vld [vmem:[#allocation8 + $0x300] ss:$24 sps:$4 sm:$0xff]  }
 0x251   :  { %3190 = vmatprep.subr.bf16.mxu0 %v5971_v45  ;;  %3276 = vmatprep.subr.bf16.mxu1 %v5974_v47  ;;  %v6008_v45 = vld [vmem:[#allocation8 + $0x308] ss:$24 sps:$4 sm:$0xff]   ;;  %v6013_v47 = vld [vmem:[#allocation8 + $0x334] ss:$24 sps:$4 sm:$0xff]  }
 0x254   :  { %3191 = vmatpush1.bf16.msra.mxu0 %v5969_v50  ;;  %3277 = vmatpush1.bf16.msra.mxu1 %v5972_v51  ;;  %v6016_v50 = vld [vmem:[#allocation8 + $0x33c] ss:$24 sps:$4 sm:$0xff]   ;;  %v6011_v51 = vld [vmem:[#allocation8 + $0x330] ss:$24 sps:$4 sm:$0xff]  }
 0x255   :  { %3192 = vmatprep.subr.bf16.mxu0 %v5977_v53  ;;  %3278 = vmatprep.subr.bf16.mxu1 %v5980_v54  ;;  %v6014_v53 = vld [vmem:[#allocation8 + $0x338] ss:$24 sps:$4 sm:$0xff]   ;;  %v6019_v54 = vld [vmem:[#allocation8 + $0x364] ss:$24 sps:$4 sm:$0xff]  }
 0x258   :  { %3193 = vmatpush1.bf16.msra.mxu0 %v5975_v38  ;;  %3279 = vmatpush1.bf16.msra.mxu1 %v5978_v55  ;;  %v6022_v38 = vld [vmem:[#allocation8 + $0x36c] ss:$24 sps:$4 sm:$0xff]   ;;  %v6017_v55 = vld [vmem:[#allocation8 + $0x360] ss:$24 sps:$4 sm:$0xff]  }
 0x259   :  { %3194 = vmatprep.subr.bf16.mxu0 %v5983_v57  ;;  %3280 = vmatprep.subr.bf16.mxu1 %v5986_v58  ;;  %v6020_v57 = vld [vmem:[#allocation8 + $0x368] ss:$24 sps:$4 sm:$0xff]   ;;  %v6025_v58 = vld [vmem:[#allocation8 + $0x394] ss:$24 sps:$4 sm:$0xff]  }
 0x25c   :  { %3195 = vmatpush1.bf16.msra.mxu0 %v5981_v60  ;;  %3281 = vmatpush1.bf16.msra.mxu1 %v5984_v61  ;;  %v6028_v60 = vld [vmem:[#allocation8 + $0x39c] ss:$24 sps:$4 sm:$0xff]   ;;  %v6023_v61 = vld [vmem:[#allocation8 + $0x390] ss:$24 sps:$4 sm:$0xff]  }
 0x25d   :  { %3196 = vmatprep.subr.bf16.mxu0 %v5989_v62  ;;  %3282 = vmatprep.subr.bf16.mxu1 %v5992_v63  ;;  %v6026_v62 = vld [vmem:[#allocation8 + $0x398] ss:$24 sps:$4 sm:$0xff]   ;;  %v6031_v63 = vld [vmem:[#allocation8 + $0x3c4] ss:$24 sps:$4 sm:$0xff]  }
 0x260   :  { %3197 = vmatpush1.bf16.msra.mxu0 %v5987_v0  ;;  %3283 = vmatpush1.bf16.msra.mxu1 %v5990_v1  ;;  %v6034_v0 = vld [vmem:[#allocation8 + $0x3cc] ss:$24 sps:$4 sm:$0xff]   ;;  %v6029_v1 = vld [vmem:[#allocation8 + $0x3c0] ss:$24 sps:$4 sm:$0xff]  }
 0x261   :  { %3198 = vmatprep.subr.bf16.mxu0 %v5995_v2  ;;  %3284 = vmatprep.subr.bf16.mxu1 %v5998_v3  ;;  %v6032_v2 = vld [vmem:[#allocation8 + $0x3c8] ss:$24 sps:$4 sm:$0xff]   ;;  %v6037_v3 = vld [vmem:[#allocation8 + $0x3f4] ss:$24 sps:$4 sm:$0xff]  }
 0x264   :  { %3199 = vmatpush1.bf16.msra.mxu0 %v5993_v4  ;;  %3285 = vmatpush1.bf16.msra.mxu1 %v5996_v5  ;;  %v6040_v4 = vld [vmem:[#allocation8 + $0x3fc] ss:$24 sps:$4 sm:$0xff]   ;;  %v6035_v5 = vld [vmem:[#allocation8 + $0x3f0] ss:$24 sps:$4 sm:$0xff]  }
 0x265   :  { %3200 = vmatprep.subr.bf16.mxu0 %v6001_v6  ;;  %3286 = vmatprep.subr.bf16.mxu1 %v6004_v21  ;;  %v6038_v6 = vld [vmem:[#allocation8 + $0x3f8] ss:$24 sps:$4 sm:$0xff]   ;;  %v6043_v21 = vld [vmem:[#allocation8 + $0x424] ss:$24 sps:$4 sm:$0xff]  }
 0x268   :  { %3201 = vmatpush1.bf16.msra.mxu0 %v5999_v7  ;;  %3287 = vmatpush1.bf16.msra.mxu1 %v6002_v8  ;;  %v6046_v7 = vld [vmem:[#allocation8 + $0x42c] ss:$24 sps:$4 sm:$0xff]   ;;  %v6041_v8 = vld [vmem:[#allocation8 + $0x420] ss:$24 sps:$4 sm:$0xff]  }
 0x269   :  { %3213 = vmatprep.subr.bf16.mxu0 %v6007_v9  ;;  %3299 = vmatprep.subr.bf16.mxu1 %v6010_v10  ;;  %v6044_v9 = vld [vmem:[#allocation8 + $0x428] ss:$24 sps:$4 sm:$0xff]   ;;  %v6049_v10 = vld [vmem:[#allocation8 + $0x454] ss:$24 sps:$4 sm:$0xff]  }
 0x2fe   :  { %v2187_v14 = vpop.f32.mrb[0].mxu0  ;;  %v2359_v15 = vpop.f32.mrb[16].mxu1 }
 0x2ff   :  { %v5445_v16 = vadd.f32 %v2187_v14, %v727_v52  ;;  %v5449_v59 = vadd.f32 %v2359_v15, %v735_v48  ;;  %v2189_v56 = vpop.f32.mrb[1].mxu0  ;;  %v2361_v17 = vpop.f32.mrb[17].mxu1  ;;  %v6053_v14 = vld [vmem:[#allocation8 + $0x480] ss:$24 sps:$4 sm:$0xff]  }
 0x300   :  { %v5446_v18 = vadd.f32 %v2189_v56, %v731_v12  ;;  %v5450_v19 = vadd.f32 %v2361_v17, %v739_v13  ;;  %v2191_v20 = vpop.f32.mrb[2].mxu0  ;;  %v2363_v22 = vpop.f32.mrb[18].mxu1  ;;  %v6056_v15 = vld [vmem:[#allocation8 + $0x488] ss:$24 sps:$4 sm:$0xff]   ;;  %v6062_v17 = vld [vmem:[#allocation8 + $0x4b8] ss:$24 sps:$4 sm:$0xff]  }
 0x301   :  { %v5447_v23 = vadd.f32 %v2191_v20, %v727_v52  ;;  %v5451_v24 = vadd.f32 %v2363_v22, %v735_v48  ;;  %v2193_v25 = vpop.f32.mrb[3].mxu0  ;;  %v2365_v26 = vpop.f32.mrb[19].mxu1  ;;  %v2368_v29 = vmax.f32 %v5445_v16, 0.0  ;;  %v2370_v30 = vmax.f32 %v5449_v59, 0.0  ;;  %v6047_v52 = vld [vmem:[#allocation8 + $0x450] ss:$24 sps:$4 sm:$0xff]  }
 0x302   :  { %v5448_v27 = vadd.f32 %v2193_v25, %v731_v12  ;;  %v5452_v28 = vadd.f32 %v2365_v26, %v739_v13  ;;  %v2369_v33 = vmax.f32 %v5446_v18, 0.0  ;;  %v2371_v34 = vmax.f32 %v5450_v19, 0.0  ;;  %v6050_v48 = vld [vmem:[#allocation8 + $0x458] ss:$24 sps:$4 sm:$0xff]   ;;  %v6055_v12 = vld [vmem:[#allocation8 + $0x484] ss:$24 sps:$4 sm:$0xff]  }
 0x303   :  { %v2372_v31 = vmax.f32 %v5447_v23, 0.0  ;;  %v2374_v32 = vmax.f32 %v5451_v24, 0.0  ;;  %v6058_v13 = vld [vmem:[#allocation8 + $0x48c] ss:$24 sps:$4 sm:$0xff]   ;;  %v6064_v59 = vld [vmem:[#allocation8 + $0x4bc] ss:$24 sps:$4 sm:$0xff]  }
 0x304   :  { %v2373_v35 = vmax.f32 %v5448_v27, 0.0  ;;  %v2375_v36 = vmax.f32 %v5452_v28, 0.0  ;;  %v6061_v16 = vld [vmem:[#allocation8 + $0x4b4] ss:$24 sps:$4 sm:$0xff]   ;;  %v6059_v56 = vld [vmem:[#allocation8 + $0x4b0] ss:$24 sps:$4 sm:$0xff]  }
 0x305   :  { %v2376_v41 = vpack.c.bf16 %v2372_v31, %v2368_v29  ;;  %v6716_v42 = vpack.c.bf16 %v2374_v32, %v2370_v30  ;;  %v6067_v18 = vld [vmem:[#allocation8 + $0x4e4] ss:$24 sps:$4 sm:$0xff]   ;;  %v6065_v20 = vld [vmem:[#allocation8 + $0x4e0] ss:$24 sps:$4 sm:$0xff]   ;;  %v6073_v23 = vld [vmem:[#allocation8 + $0x514] ss:$24 sps:$4 sm:$0xff]  }
 0x306   :  { %v2377_v43 = vpack.c.bf16 %v2373_v35, %v2369_v33  ;;  %v2379_v44 = vpack.c.bf16 %v2375_v36, %v2371_v34  ;;  %v6070_v19 = vld [vmem:[#allocation8 + $0x4ec] ss:$24 sps:$4 sm:$0xff]   ;;  %v6068_v22 = vld [vmem:[#allocation8 + $0x4e8] ss:$24 sps:$4 sm:$0xff]   ;;  %v6076_v24 = vld [vmem:[#allocation8 + $0x51c] ss:$24 sps:$4 sm:$0xff]  }
 0x307   :  { %v6071_v25 = vld [vmem:[#allocation8 + $0x510] ss:$24 sps:$4 sm:$0xff]   ;;  %v6079_v27 = vld [vmem:[#allocation8 + $0x544] ss:$24 sps:$4 sm:$0xff]   ;;  %v6077_v29 = vld [vmem:[#allocation8 + $0x540] ss:$24 sps:$4 sm:$0xff]  }
 0x308   :  { %3202 = vmatprep.mubr.bf16.mxu0 %v2377_v43  ;;  %3288 = vmatprep.mubr.bf16.mxu1 %v2377_v43  ;;  %v6074_v26 = vld [vmem:[#allocation8 + $0x518] ss:$24 sps:$4 sm:$0xff]   ;;  %v6082_v28 = vld [vmem:[#allocation8 + $0x54c] ss:$24 sps:$4 sm:$0xff]   ;;  %v6080_v30 = vld [vmem:[#allocation8 + $0x548] ss:$24 sps:$4 sm:$0xff]  }
 0x309   :  { %3203 = vmatmul.mubr.bf16.vlgmr.msra.gmra.mrb[4].mxu0 %v2376_v41  ;;  %3289 = vmatmul.mubr.bf16.vlgmr.msra.gmra.mrb[20].mxu1 %v2376_v41  ;;  %v6085_v31 = vld [vmem:[#allocation8 + $0x574] ss:$24 sps:$4 sm:$0xff]   ;;  %v6083_v33 = vld [vmem:[#allocation8 + $0x570] ss:$24 sps:$4 sm:$0xff]   ;;  %v6091_v35 = vld [vmem:[#allocation8 + $0x5a4] ss:$24 sps:$4 sm:$0xff]  }
 0x30a   :  { %3214 = vmatpush1.bf16.msra.mxu0 %v6005_v37  ;;  %3300 = vmatpush1.bf16.msra.mxu1 %v6008_v45  ;;  %v6088_v32 = vld [vmem:[#allocation8 + $0x57c] ss:$24 sps:$4 sm:$0xff]   ;;  %v6086_v34 = vld [vmem:[#allocation8 + $0x578] ss:$24 sps:$4 sm:$0xff]   ;;  %v6094_v36 = vld [vmem:[#allocation8 + $0x5ac] ss:$24 sps:$4 sm:$0xff]  }
 0x30b   :  { %3245 = vmatprep.mubr.bf16.mxu0 %v2379_v44  ;;  %3331 = vmatprep.mubr.bf16.mxu1 %v2379_v44  ;;  %v6089_v41 = vld [vmem:[#allocation8 + $0x5a0] ss:$24 sps:$4 sm:$0xff]   ;;  %v6097_v44 = vld [vmem:[#allocation8 + $0x5d4] ss:$24 sps:$4 sm:$0xff]   ;;  %v6095_v45 = vld [vmem:[#allocation8 + $0x5d0] ss:$24 sps:$4 sm:$0xff]  }
 0x30c   :  { %3215 = vmatprep.subr.bf16.mxu0 %v6013_v47  ;;  %3301 = vmatprep.subr.bf16.mxu1 %v6016_v50  ;;  %v6092_v43 = vld [vmem:[#allocation8 + $0x5a8] ss:$24 sps:$4 sm:$0xff]   ;;  %v6100_v37 = vld [vmem:[#allocation8 + $0x5dc] ss:$24 sps:$4 sm:$0xff]   ;;  %v6098_v47 = vld [vmem:[#allocation8 + $0x5d8] ss:$24 sps:$4 sm:$0xff]  }
 0x30d   :  { %v6103_v50 = vld [vmem:[#allocation8 + $0x14] ss:$24 sps:$4 sm:$0xff]  }
 0x30e   :  { %3216 = vmatpush1.bf16.msra.mxu0 %v6011_v51  ;;  %3302 = vmatpush1.bf16.msra.mxu1 %v6014_v53  ;;  %v6101_v51 = vld [vmem:[#allocation8 + $0x10] ss:$24 sps:$4 sm:$0xff]   ;;  %v6106_v53 = vld [vmem:[#allocation8 + $0x44] ss:$24 sps:$4 sm:$0xff]  }
 0x30f   :  { %3217 = vmatprep.subr.bf16.mxu0 %v6019_v54  ;;  %3303 = vmatprep.subr.bf16.mxu1 %v6022_v38  ;;  %v6104_v54 = vld [vmem:[#allocation8 + $0x40] ss:$24 sps:$4 sm:$0xff]   ;;  %v6109_v38 = vld [vmem:[#allocation8 + $0x74] ss:$24 sps:$4 sm:$0xff]  }
 0x312   :  { %3218 = vmatpush1.bf16.msra.mxu0 %v6017_v55  ;;  %3304 = vmatpush1.bf16.msra.mxu1 %v6020_v57  ;;  %v6107_v55 = vld [vmem:[#allocation8 + $0x70] ss:$24 sps:$4 sm:$0xff]   ;;  %v6112_v57 = vld [vmem:[#allocation8 + $0xa4] ss:$24 sps:$4 sm:$0xff]  }
 0x313   :  { %3219 = vmatprep.subr.bf16.mxu0 %v6025_v58  ;;  %3305 = vmatprep.subr.bf16.mxu1 %v6028_v60  ;;  %v6110_v58 = vld [vmem:[#allocation8 + $0xa0] ss:$24 sps:$4 sm:$0xff]   ;;  %v6115_v60 = vld [vmem:[#allocation8 + $0xd4] ss:$24 sps:$4 sm:$0xff]  }
 0x316   :  { %3220 = vmatpush1.bf16.msra.mxu0 %v6023_v61  ;;  %3306 = vmatpush1.bf16.msra.mxu1 %v6026_v62  ;;  %v6113_v61 = vld [vmem:[#allocation8 + $0xd0] ss:$24 sps:$4 sm:$0xff]   ;;  %v6118_v62 = vld [vmem:[#allocation8 + $0x104] ss:$24 sps:$4 sm:$0xff]  }
 0x317   :  { %3221 = vmatprep.subr.bf16.mxu0 %v6031_v63  ;;  %3307 = vmatprep.subr.bf16.mxu1 %v6034_v0  ;;  %v6116_v63 = vld [vmem:[#allocation8 + $0x100] ss:$24 sps:$4 sm:$0xff]   ;;  %v6119_v0 = vld [vmem:[#allocation8 + $0x130] ss:$24 sps:$4 sm:$0xff]  }
 0x31a   :  { %3222 = vmatpush1.bf16.msra.mxu0 %v6029_v1  ;;  %3308 = vmatpush1.bf16.msra.mxu1 %v6032_v2  ;;  %v6124_v1 = vld [vmem:[#allocation8 + $0x164] ss:$24 sps:$4 sm:$0xff]   ;;  %v6122_v2 = vld [vmem:[#allocation8 + $0x160] ss:$24 sps:$4 sm:$0xff]  }
 0x31b   :  { %3223 = vmatprep.subr.bf16.mxu0 %v6037_v3  ;;  %3309 = vmatprep.subr.bf16.mxu1 %v6040_v4  ;;  %v6127_v3 = vld [vmem:[#allocation8 + $0x194] ss:$24 sps:$4 sm:$0xff]   ;;  %v6125_v4 = vld [vmem:[#allocation8 + $0x190] ss:$24 sps:$4 sm:$0xff]  }
 0x31e   :  { %3224 = vmatpush1.bf16.msra.mxu0 %v6035_v5  ;;  %3310 = vmatpush1.bf16.msra.mxu1 %v6038_v6  ;;  %v6130_v5 = vld [vmem:[#allocation8 + $0x1c4] ss:$24 sps:$4 sm:$0xff]   ;;  %v6128_v6 = vld [vmem:[#allocation8 + $0x1c0] ss:$24 sps:$4 sm:$0xff]  }
 0x31f   :  { %3225 = vmatprep.subr.bf16.mxu0 %v6043_v21  ;;  %3311 = vmatprep.subr.bf16.mxu1 %v6046_v7  ;;  %v6133_v21 = vld [vmem:[#allocation8 + $0x1f4] ss:$24 sps:$4 sm:$0xff]   ;;  %v6131_v7 = vld [vmem:[#allocation8 + $0x1f0] ss:$24 sps:$4 sm:$0xff]  }
 0x322   :  { %3226 = vmatpush1.bf16.msra.mxu0 %v6041_v8  ;;  %3312 = vmatpush1.bf16.msra.mxu1 %v6044_v9  ;;  %v6136_v8 = vld [vmem:[#allocation8 + $0x224] ss:$24 sps:$4 sm:$0xff]   ;;  %v6134_v9 = vld [vmem:[#allocation8 + $0x220] ss:$24 sps:$4 sm:$0xff]  }
 0x323   :  { %3227 = vmatprep.subr.bf16.mxu0 %v6049_v10  ;;  %3313 = vmatprep.subr.bf16.mxu1 %v6052_v11  ;;  %v6139_v10 = vld [vmem:[#allocation8 + $0x254] ss:$24 sps:$4 sm:$0xff]   ;;  %v6137_v11 = vld [vmem:[#allocation8 + $0x250] ss:$24 sps:$4 sm:$0xff]  }
 0x326   :  { %3228 = vmatpush1.bf16.msra.mxu0 %v6047_v52  ;;  %3314 = vmatpush1.bf16.msra.mxu1 %v6050_v48  ;;  %v6142_v52 = vld [vmem:[#allocation8 + $0x284] ss:$24 sps:$4 sm:$0xff]   ;;  %v6140_v48 = vld [vmem:[#allocation8 + $0x280] ss:$24 sps:$4 sm:$0xff]  }
 0x327   :  { %3229 = vmatprep.subr.bf16.mxu0 %v6055_v12  ;;  %3315 = vmatprep.subr.bf16.mxu1 %v6058_v13  ;;  %v6145_v12 = vld [vmem:[#allocation8 + $0x2b4] ss:$24 sps:$4 sm:$0xff]   ;;  %v6143_v13 = vld [vmem:[#allocation8 + $0x2b0] ss:$24 sps:$4 sm:$0xff]  }
 0x32a   :  { %3230 = vmatpush1.bf16.msra.mxu0 %v6053_v14  ;;  %3316 = vmatpush1.bf16.msra.mxu1 %v6056_v15  ;;  %v6148_v14 = vld [vmem:[#allocation8 + $0x2e4] ss:$24 sps:$4 sm:$0xff]   ;;  %v6146_v15 = vld [vmem:[#allocation8 + $0x2e0] ss:$24 sps:$4 sm:$0xff]  }
 0x32b   :  { %3231 = vmatprep.subr.bf16.mxu0 %v6061_v16  ;;  %3317 = vmatprep.subr.bf16.mxu1 %v6064_v59  ;;  %v6151_v16 = vld [vmem:[#allocation8 + $0x314] ss:$24 sps:$4 sm:$0xff]  }
 0x32c   :  { %v6197_v59 = vld [vmem:[#allocation10] ss:$12 sps:$4 sm:$0xff]  }
 0x32e   :  { %3232 = vmatpush1.bf16.msra.mxu0 %v6059_v56  ;;  %3318 = vmatpush1.bf16.msra.mxu1 %v6062_v17  ;;  %v6199_v56 = vld [vmem:[#allocation10 + $0x4] ss:$12 sps:$4 sm:$0xff]   ;;  %v6202_v17 = vld [vmem:[#allocation10 + $0x1c] ss:$12 sps:$4 sm:$0xff]  }
 0x32f   :  { %3233 = vmatprep.subr.bf16.mxu0 %v6067_v18  ;;  %3319 = vmatprep.subr.bf16.mxu1 %v6070_v19  ;;  %v6200_v18 = vld [vmem:[#allocation10 + $0x18] ss:$12 sps:$4 sm:$0xff]   ;;  %v6205_v19 = vld [vmem:[#allocation10 + $0x34] ss:$12 sps:$4 sm:$0xff]  }
 0x332   :  { %3234 = vmatpush1.bf16.msra.mxu0 %v6065_v20  ;;  %3320 = vmatpush1.bf16.msra.mxu1 %v6068_v22  ;;  %v6203_v20 = vld [vmem:[#allocation10 + $0x30] ss:$12 sps:$4 sm:$0xff]   ;;  %v6208_v22 = vld [vmem:[#allocation10 + $0x4c] ss:$12 sps:$4 sm:$0xff]  }
 0x333   :  { %3235 = vmatprep.subr.bf16.mxu0 %v6073_v23  ;;  %3321 = vmatprep.subr.bf16.mxu1 %v6076_v24  ;;  %v6206_v23 = vld [vmem:[#allocation10 + $0x48] ss:$12 sps:$4 sm:$0xff]   ;;  %v6211_v24 = vld [vmem:[#allocation10 + $0x64] ss:$12 sps:$4 sm:$0xff]  }
 0x336   :  { %3236 = vmatpush1.bf16.msra.mxu0 %v6071_v25  ;;  %3322 = vmatpush1.bf16.msra.mxu1 %v6074_v26  ;;  %v6209_v25 = vld [vmem:[#allocation10 + $0x60] ss:$12 sps:$4 sm:$0xff]   ;;  %v6214_v26 = vld [vmem:[#allocation10 + $0x7c] ss:$12 sps:$4 sm:$0xff]  }
 0x337   :  { %3237 = vmatprep.subr.bf16.mxu0 %v6079_v27  ;;  %3323 = vmatprep.subr.bf16.mxu1 %v6082_v28  ;;  %v6212_v27 = vld [vmem:[#allocation10 + $0x78] ss:$12 sps:$4 sm:$0xff]   ;;  %v6217_v28 = vld [vmem:[#allocation10 + $0x94] ss:$12 sps:$4 sm:$0xff]  }
 0x33a   :  { %3238 = vmatpush1.bf16.msra.mxu0 %v6077_v29  ;;  %3324 = vmatpush1.bf16.msra.mxu1 %v6080_v30  ;;  %v6215_v29 = vld [vmem:[#allocation10 + $0x90] ss:$12 sps:$4 sm:$0xff]   ;;  %v6220_v30 = vld [vmem:[#allocation10 + $0xac] ss:$12 sps:$4 sm:$0xff]  }
 0x33b   :  { %3239 = vmatprep.subr.bf16.mxu0 %v6085_v31  ;;  %3325 = vmatprep.subr.bf16.mxu1 %v6088_v32  ;;  %v6218_v31 = vld [vmem:[#allocation10 + $0xa8] ss:$12 sps:$4 sm:$0xff]   ;;  %v6223_v32 = vld [vmem:[#allocation10 + $0xc4] ss:$12 sps:$4 sm:$0xff]  }
 0x33e   :  { %3240 = vmatpush1.bf16.msra.mxu0 %v6083_v33  ;;  %3326 = vmatpush1.bf16.msra.mxu1 %v6086_v34  ;;  %v6221_v33 = vld [vmem:[#allocation10 + $0xc0] ss:$12 sps:$4 sm:$0xff]   ;;  %v6226_v34 = vld [vmem:[#allocation10 + $0xdc] ss:$12 sps:$4 sm:$0xff]  }
 0x33f   :  { %3241 = vmatprep.subr.bf16.mxu0 %v6091_v35  ;;  %3327 = vmatprep.subr.bf16.mxu1 %v6094_v36  ;;  %v6224_v35 = vld [vmem:[#allocation10 + $0xd8] ss:$12 sps:$4 sm:$0xff]   ;;  %v6229_v36 = vld [vmem:[#allocation10 + $0xf4] ss:$12 sps:$4 sm:$0xff]  }
 0x342   :  { %3242 = vmatpush1.bf16.msra.mxu0 %v6089_v41  ;;  %3328 = vmatpush1.bf16.msra.mxu1 %v6092_v43  ;;  %v6227_v41 = vld [vmem:[#allocation10 + $0xf0] ss:$12 sps:$4 sm:$0xff]   ;;  %v6232_v43 = vld [vmem:[#allocation10 + $0x10c] ss:$12 sps:$4 sm:$0xff]  }
 0x343   :  { %3243 = vmatprep.subr.bf16.mxu0 %v6097_v44  ;;  %3329 = vmatprep.subr.bf16.mxu1 %v6100_v37  ;;  %v6230_v44 = vld [vmem:[#allocation10 + $0x108] ss:$12 sps:$4 sm:$0xff]   ;;  %v6235_v37 = vld [vmem:[#allocation10 + $0x124] ss:$12 sps:$4 sm:$0xff]  }
 0x346   :  { %3244 = vmatpush1.bf16.msra.mxu0 %v6095_v45  ;;  %3330 = vmatpush1.bf16.msra.mxu1 %v6098_v47  ;;  %v2508_v45 = vld [vmem:[#allocation13 + $0xc] sm:$0xf] }
 0x347   :  { %3750 = vmatprep.subr.bf16.mxu0 %v6103_v50  ;;  %4046 = vmatprep.subr.bf16.mxu1 %v6199_v56  ;;  %v6233_v47 = vld [vmem:[#allocation10 + $0x120] ss:$12 sps:$4 sm:$0xff]   ;;  %v6238_v50 = vld [vmem:[#allocation10 + $0x13c] ss:$12 sps:$4 sm:$0xff]  }
 0x348   :  { %v6152_v56 = vld [vmem:[#allocation8 + $0x340] ss:$24 sps:$4 sm:$0xff]  }
 0x349   :  { %3246 = vmatmul.mubr.bf16.vlgmr.msra.gmra.mrb[4].mxu0 %v6716_v42  ;;  %3332 = vmatmul.mubr.bf16.vlgmr.msra.gmra.mrb[20].mxu1 %v6716_v42  ;;  %v6121_v42 = vld [vmem:[#allocation8 + $0x134] ss:$24 sps:$4 sm:$0xff]  }
 0x34a   :  { %3751 = vmatpush1.bf16.msra.mxu0 %v6101_v51  ;;  %4047 = vmatpush1.bf16.msra.mxu1 %v6197_v59  ;;  %v2513_v51 = vrot.slane %v2508_v45, %v6665_v39  ;;  %v6154_v59 = vld [vmem:[#allocation8 + $0x344] ss:$24 sps:$4 sm:$0xff]  }
 0x34b   :  { %3752 = vmatprep.subr.bf16.mxu0 %v6106_v53  ;;  %4048 = vmatprep.subr.bf16.mxu1 %v6202_v17  ;;  %v2521_v53 = vrot.slane %v2508_v45, %v6675_v46  ;;  %v6157_v17 = vld [vmem:[#allocation8 + $0x374] ss:$24 sps:$4 sm:$0xff]  }
 0x34e   :  { %3753 = vmatpush1.bf16.msra.mxu0 %v6104_v54  ;;  %4049 = vmatpush1.bf16.msra.mxu1 %v6200_v18  ;;  %v2517_v54 = vrot.slane %v2508_v45, %v6668_v40  ;;  %v6155_v18 = vld [vmem:[#allocation8 + $0x370] ss:$24 sps:$4 sm:$0xff]  }
 0x34f   :  { %3754 = vmatprep.subr.bf16.mxu0 %v6109_v38  ;;  %4050 = vmatprep.subr.bf16.mxu1 %v6205_v19  ;;  %v2525_v38 = vrot.slane %v2508_v45, %v6678_v49  ;;  %v6160_v19 = vld [vmem:[#allocation8 + $0x3a4] ss:$24 sps:$4 sm:$0xff]   ;;  %v6188_v45 = vld [vmem:[#allocation8 + $0x580] ss:$24 sps:$4 sm:$0xff]  }
 0x352   :  { %3755 = vmatpush1.bf16.msra.mxu0 %v6107_v55  ;;  %4051 = vmatpush1.bf16.msra.mxu1 %v6203_v20  ;;  %v6236_v55 = vld [vmem:[#allocation10 + $0x138] ss:$12 sps:$4 sm:$0xff]  }
 0x353   :  { %3756 = vmatprep.subr.bf16.mxu0 %v6112_v57  ;;  %4052 = vmatprep.subr.bf16.mxu1 %v6208_v22  ;;  %v6158_v20 = vld [vmem:[#allocation8 + $0x3a0] ss:$24 sps:$4 sm:$0xff]   ;;  %v6163_v22 = vld [vmem:[#allocation8 + $0x3d4] ss:$24 sps:$4 sm:$0xff]  }
 0x356   :  { %3757 = vmatpush1.bf16.msra.mxu0 %v6110_v58  ;;  %4053 = vmatpush1.bf16.msra.mxu1 %v6206_v23  ;;  %v6161_v23 = vld [vmem:[#allocation8 + $0x3d0] ss:$24 sps:$4 sm:$0xff]  }
 0x357   :  { %3758 = vmatprep.subr.bf16.mxu0 %v6115_v60  ;;  %4054 = vmatprep.subr.bf16.mxu1 %v6211_v24  ;;  %v6166_v24 = vld [vmem:[#allocation8 + $0x404] ss:$24 sps:$4 sm:$0xff]  }
 0x35a   :  { %3759 = vmatpush1.bf16.msra.mxu0 %v6113_v61  ;;  %4055 = vmatpush1.bf16.msra.mxu1 %v6209_v25  ;;  %v6164_v25 = vld [vmem:[#allocation8 + $0x400] ss:$24 sps:$4 sm:$0xff]  }
 0x35b   :  { %3760 = vmatprep.subr.bf16.mxu0 %v6118_v62  ;;  %4056 = vmatprep.subr.bf16.mxu1 %v6214_v26  ;;  %v6169_v26 = vld [vmem:[#allocation8 + $0x434] ss:$24 sps:$4 sm:$0xff]  }
 0x35e   :  { %3761 = vmatpush1.bf16.msra.mxu0 %v6116_v63  ;;  %4057 = vmatpush1.bf16.msra.mxu1 %v6212_v27  ;;  %v6167_v27 = vld [vmem:[#allocation8 + $0x430] ss:$24 sps:$4 sm:$0xff]  }
 0x35f   :  { %3762 = vmatprep.subr.bf16.mxu0 %v6121_v42  ;;  %4058 = vmatprep.subr.bf16.mxu1 %v6217_v28  ;;  %v6172_v28 = vld [vmem:[#allocation8 + $0x464] ss:$24 sps:$4 sm:$0xff]  }
 0x362   :  { %3763 = vmatpush1.bf16.msra.mxu0 %v6119_v0  ;;  %4059 = vmatpush1.bf16.msra.mxu1 %v6215_v29  ;;  %v6170_v29 = vld [vmem:[#allocation8 + $0x460] ss:$24 sps:$4 sm:$0xff]  }
 0x363   :  { %3764 = vmatprep.subr.bf16.mxu0 %v6124_v1  ;;  %4060 = vmatprep.subr.bf16.mxu1 %v6220_v30  ;;  %v6175_v30 = vld [vmem:[#allocation8 + $0x494] ss:$24 sps:$4 sm:$0xff]  }
 0x366   :  { %3765 = vmatpush1.bf16.msra.mxu0 %v6122_v2  ;;  %4061 = vmatpush1.bf16.msra.mxu1 %v6218_v31  ;;  %v6173_v31 = vld [vmem:[#allocation8 + $0x490] ss:$24 sps:$4 sm:$0xff]  }
 0x367   :  { %3766 = vmatprep.subr.bf16.mxu0 %v6127_v3  ;;  %4062 = vmatprep.subr.bf16.mxu1 %v6223_v32  ;;  %v6178_v32 = vld [vmem:[#allocation8 + $0x4c4] ss:$24 sps:$4 sm:$0xff]  }
 0x36a   :  { %3767 = vmatpush1.bf16.msra.mxu0 %v6125_v4  ;;  %4063 = vmatpush1.bf16.msra.mxu1 %v6221_v33  ;;  %v6176_v33 = vld [vmem:[#allocation8 + $0x4c0] ss:$24 sps:$4 sm:$0xff]  }
 0x36b   :  { %3768 = vmatprep.subr.bf16.mxu0 %v6130_v5  ;;  %4064 = vmatprep.subr.bf16.mxu1 %v6226_v34  ;;  %v6181_v34 = vld [vmem:[#allocation8 + $0x4f4] ss:$24 sps:$4 sm:$0xff]  }
 0x36e   :  { %3769 = vmatpush1.bf16.msra.mxu0 %v6128_v6  ;;  %4065 = vmatpush1.bf16.msra.mxu1 %v6224_v35  ;;  %v6179_v35 = vld [vmem:[#allocation8 + $0x4f0] ss:$24 sps:$4 sm:$0xff]  }
 0x36f   :  { %3770 = vmatprep.subr.bf16.mxu0 %v6133_v21  ;;  %4066 = vmatprep.subr.bf16.mxu1 %v6229_v36  ;;  %v6184_v36 = vld [vmem:[#allocation8 + $0x524] ss:$24 sps:$4 sm:$0xff]  }
 0x372   :  { %3771 = vmatpush1.bf16.msra.mxu0 %v6131_v7  ;;  %4067 = vmatpush1.bf16.msra.mxu1 %v6227_v41  ;;  %v6182_v41 = vld [vmem:[#allocation8 + $0x520] ss:$24 sps:$4 sm:$0xff]  }
 0x373   :  { %3772 = vmatprep.subr.bf16.mxu0 %v6136_v8  ;;  %4068 = vmatprep.subr.bf16.mxu1 %v6232_v43  ;;  %v6187_v43 = vld [vmem:[#allocation8 + $0x554] ss:$24 sps:$4 sm:$0xff]  }
 0x376   :  { %3773 = vmatpush1.bf16.msra.mxu0 %v6134_v9  ;;  %4069 = vmatpush1.bf16.msra.mxu1 %v6230_v44  ;;  %v6185_v44 = vld [vmem:[#allocation8 + $0x550] ss:$24 sps:$4 sm:$0xff]  }
 0x377   :  { %3774 = vmatprep.subr.bf16.mxu0 %v6139_v10  ;;  %4070 = vmatprep.subr.bf16.mxu1 %v6235_v37  ;;  %v6190_v37 = vld [vmem:[#allocation8 + $0x584] ss:$24 sps:$4 sm:$0xff]  }
 0x37a   :  { %3775 = vmatpush1.bf16.msra.mxu0 %v6137_v11  ;;  %4071 = vmatpush1.bf16.msra.mxu1 %v6233_v47  ;;  %v6193_v47 = vld [vmem:[#allocation8 + $0x5b4] ss:$24 sps:$4 sm:$0xff]  }
 0x37b   :  { %3776 = vmatprep.subr.bf16.mxu0 %v6142_v52  ;;  %4072 = vmatprep.subr.bf16.mxu1 %v6238_v50  ;;  %v6191_v50 = vld [vmem:[#allocation8 + $0x5b0] ss:$24 sps:$4 sm:$0xff]  }
 0x37e   :  { %3777 = vmatpush1.bf16.msra.mxu0 %v6140_v48  ;;  %4073 = vmatpush1.bf16.msra.mxu1 %v6236_v55  ;;  %v6244_v55 = vld [vmem:[#allocation10 + $0x16c] ss:$12 sps:$4 sm:$0xff]  }
 0x37f   :  { %3778 = vmatprep.subr.bf16.mxu0 %v6145_v12 }
 0x382   :  { %3779 = vmatpush1.bf16.msra.mxu0 %v6143_v13 }
 0x383   :  { %3780 = vmatprep.subr.bf16.mxu0 %v6148_v14 }
 0x386   :  { %3781 = vmatpush1.bf16.msra.mxu0 %v6146_v15 }
 0x387   :  { %3793 = vmatprep.subr.bf16.mxu0 %v6151_v16  ;;  %v6149_v16 = vld [vmem:[#allocation8 + $0x310] ss:$24 sps:$4 sm:$0xff]  }
 0x41c   :  { %v3247_v57 = vpop.f32.mrb[4].mxu0  ;;  %v3333_v58 = vpop.f32.mrb[20].mxu1 }
 0x41d   :  { %v5453_v60 = vadd.f32 %v3247_v57, %v2513_v51  ;;  %v5457_v61 = vadd.f32 %v3333_v58, %v2521_v53  ;;  %v3249_v62 = vpop.f32.mrb[5].mxu0  ;;  %v3335_v63 = vpop.f32.mrb[21].mxu1  ;;  %v6242_v57 = vld [vmem:[#allocation10 + $0x168] ss:$12 sps:$4 sm:$0xff]  }
 0x41e   :  { %v5454_v42 = vadd.f32 %v3249_v62, %v2517_v54  ;;  %v5458_v0 = vadd.f32 %v3335_v63, %v2525_v38  ;;  %v3251_v1 = vpop.f32.mrb[6].mxu0  ;;  %v3337_v2 = vpop.f32.mrb[22].mxu1  ;;  %v6245_v58 = vld [vmem:[#allocation10 + $0xc8] ss:$12 sps:$4 sm:$0xff]  }
 0x41f   :  { %v5455_v3 = vadd.f32 %v3251_v1, %v2513_v51  ;;  %v5459_v46 = vadd.f32 %v3337_v2, %v2521_v53  ;;  %v3253_v4 = vpop.f32.mrb[7].mxu0  ;;  %v3339_v5 = vpop.f32.mrb[23].mxu1  ;;  %v3342_v21 = vmax.f32 %v5453_v60, 0.0  ;;  %v3344_v7 = vmax.f32 %v5457_v61, 0.0  ;;  %v6196_v51 = vld [vmem:[#allocation8 + $0x5e4] ss:$24 sps:$4 sm:$0xff]  }
 0x420   :  { %v5456_v6 = vadd.f32 %v3253_v4, %v2517_v54  ;;  %v5460_v49 = vadd.f32 %v3339_v5, %v2525_v38  ;;  %v3343_v10 = vmax.f32 %v5454_v42, 0.0  ;;  %v3345_v11 = vmax.f32 %v5458_v0, 0.0  ;;  %v6194_v53 = vld [vmem:[#allocation8 + $0x5e0] ss:$24 sps:$4 sm:$0xff]   ;;  %v6239_v38 = vld [vmem:[#allocation10 + $0x150] ss:$12 sps:$4 sm:$0xff]  }
 0x421   :  { %v3346_v8 = vmax.f32 %v5455_v3, 0.0  ;;  %v3348_v9 = vmax.f32 %v5459_v46, 0.0  ;;  %v6241_v54 = vld [vmem:[#allocation10 + $0x154] ss:$12 sps:$4 sm:$0xff]   ;;  %v3418_v60 = vld [vmem:[#allocation13 + $0x10] sm:$0x3] }
 0x422   :  { %v3347_v52 = vmax.f32 %v5456_v6, 0.0  ;;  %v3349_v48 = vmax.f32 %v5460_v49, 0.0  ;;  %4074 = vmatprep.subr.bf16.mxu1 %v6241_v54  ;;  %v3423_v61 = vrot.slane %v3418_v60, %v6665_v39  ;;  %v3427_v62 = vrot.slane %v3418_v60, %v6668_v40  ;;  %v6270_v54 = vld [vmem:[#allocation11 + $0x24] ss:$16 sps:$4 sm:$0xff]  }
 0x423   :  { %v3350_v12 = vpack.c.bf16 %v3346_v8, %v3342_v21  ;;  %v6724_v13 = vpack.c.bf16 %v3348_v9, %v3344_v7  ;;  %4075 = vmatpush1.bf16.msra.mxu1 %v6239_v38  ;;  %v6246_v9 = vld [vmem:[#allocation10 + $0x8] ss:$12 sps:$4 sm:$0xff]  }
 0x424   :  { %v3351_v14 = vpack.c.bf16 %v3347_v52, %v3343_v10  ;;  %v3353_v15 = vpack.c.bf16 %v3349_v48, %v3345_v11  ;;  %4076 = vmatprep.subr.bf16.mxu1 %v6244_v55  ;;  %v6247_v10 = vld [vmem:[#allocation10 + $0xe0] ss:$12 sps:$4 sm:$0xff]   ;;  %v6249_v52 = vld [vmem:[#allocation10 + $0xf8] ss:$12 sps:$4 sm:$0xff]  }
 0x425   :  { %v6248_v11 = vld [vmem:[#allocation10 + $0x20] ss:$12 sps:$4 sm:$0xff]   ;;  %v6250_v48 = vld [vmem:[#allocation10 + $0x38] ss:$12 sps:$4 sm:$0xff]  }
 0x426   :  { %3782 = vmatprep.mubr.bf16.mxu0 %v3351_v14  ;;  %v6253_v14 = vld [vmem:[#allocation10 + $0x128] ss:$12 sps:$4 sm:$0xff]  }
 0x427   :  { %3783 = vmatmul.mubr.bf16.vlgmr.msra.gmra.mrb[8].mxu0 %v3350_v12  ;;  %4077 = vmatpush1.bf16.msra.mxu1 %v6242_v57  ;;  %v6251_v12 = vld [vmem:[#allocation10 + $0x110] ss:$12 sps:$4 sm:$0xff]   ;;  %v6271_v38 = vld [vmem:[#allocation11 + $0x44] ss:$16 sps:$4 sm:$0xff]  }
 0x428   :  { %3794 = vmatpush1.bf16.msra.mxu0 %v6149_v16  ;;  %3825 = vmatprep.mubr.bf16.mxu0 %v3353_v15  ;;  %v6254_v15 = vld [vmem:[#allocation10 + $0x68] ss:$12 sps:$4 sm:$0xff]   ;;  %v6255_v16 = vld [vmem:[#allocation10 + $0x140] ss:$12 sps:$4 sm:$0xff]  }
 0x429   :  { %3795 = vmatprep.subr.bf16.mxu0 %v6154_v59  ;;  %5307 = vmatprep.subr.bf16.mxu1 %v6245_v58  ;;  %v6256_v59 = vld [vmem:[#allocation10 + $0x80] ss:$12 sps:$4 sm:$0xff]   ;;  %v6272_v55 = vld [vmem:[#allocation11 + $0x64] ss:$16 sps:$4 sm:$0xff]  }
 0x42a   :  { %v6273_v57 = vld [vmem:[#allocation11 + $0x84] ss:$16 sps:$4 sm:$0xff]  }
 0x42b   :  { %v6274_v58 = vld [vmem:[#allocation11 + $0xa4] ss:$16 sps:$4 sm:$0xff]  }
 0x42c   :  { %3796 = vmatpush1.bf16.msra.mxu0 %v6152_v56  ;;  %v6257_v56 = vld [vmem:[#allocation10 + $0x158] ss:$12 sps:$4 sm:$0xff]  }
 0x42d   :  { %3797 = vmatprep.subr.bf16.mxu0 %v6157_v17  ;;  %v6258_v17 = vld [vmem:[#allocation10 + $0x98] ss:$12 sps:$4 sm:$0xff]  }
 0x430   :  { %3798 = vmatpush1.bf16.msra.mxu0 %v6155_v18  ;;  %v6259_v18 = vld [vmem:[#allocation10 + $0x170] ss:$12 sps:$4 sm:$0xff]  }
 0x431   :  { %3799 = vmatprep.subr.bf16.mxu0 %v6160_v19  ;;  %v6260_v19 = vld [vmem:[#allocation10 + $0xb0] ss:$12 sps:$4 sm:$0xff]  }
 0x434   :  { %3800 = vmatpush1.bf16.msra.mxu0 %v6158_v20  ;;  %v6497_v20 = vmov 0.0  }
 0x435   :  { %3801 = vmatprep.subr.bf16.mxu0 %v6163_v22  ;;  %v3874_v22 = vld [vmem:[#allocation13 + $0x12] sm:$0x3] }
 0x438   :  { %3802 = vmatpush1.bf16.msra.mxu0 %v6161_v23  ;;  %v3879_v23 = vrot.slane %v3874_v22, %v6665_v39  ;;  %v6262_v39 = vld [vmem:[#allocation11 + $0x20] ss:$16 sps:$4 sm:$0xff]  }
 0x439   :  { %3803 = vmatprep.subr.bf16.mxu0 %v6166_v24  ;;  %v3883_v24 = vrot.slane %v3874_v22, %v6668_v40  ;;  %v6263_v40 = vld [vmem:[#allocation11 + $0x40] ss:$16 sps:$4 sm:$0xff]   ;;  %v6285_v22 = vld [vmem:[#allocation11 + $0xc] ss:$16 sps:$4 sm:$0xff]  }
 0x43c   :  { %3804 = vmatpush1.bf16.msra.mxu0 %v6164_v25 }
 0x43d   :  { %3805 = vmatprep.subr.bf16.mxu0 %v6169_v26 }
 0x440   :  { %3806 = vmatpush1.bf16.msra.mxu0 %v6167_v27 }
 0x441   :  { %3807 = vmatprep.subr.bf16.mxu0 %v6172_v28 }
 0x444   :  { %3808 = vmatpush1.bf16.msra.mxu0 %v6170_v29 }
 0x445   :  { %3809 = vmatprep.subr.bf16.mxu0 %v6175_v30 }
 0x448   :  { %3810 = vmatpush1.bf16.msra.mxu0 %v6173_v31 }
 0x449   :  { %3811 = vmatprep.subr.bf16.mxu0 %v6178_v32 }
 0x44c   :  { %3812 = vmatpush1.bf16.msra.mxu0 %v6176_v33 }
 0x44d   :  { %3813 = vmatprep.subr.bf16.mxu0 %v6181_v34 }
 0x450   :  { %3814 = vmatpush1.bf16.msra.mxu0 %v6179_v35 }
 0x451   :  { %3815 = vmatprep.subr.bf16.mxu0 %v6184_v36 }
 0x454   :  { %3816 = vmatpush1.bf16.msra.mxu0 %v6182_v41 }
 0x455   :  { %3817 = vmatprep.subr.bf16.mxu0 %v6187_v43 }
 0x458   :  { %3818 = vmatpush1.bf16.msra.mxu0 %v6185_v44  ;;  %v6261_v44 = vld [vmem:[#allocation11] ss:$16 sps:$4 sm:$0xff]  }
 0x459   :  { %3819 = vmatprep.subr.bf16.mxu0 %v6190_v37  ;;  %v6264_v37 = vld [vmem:[#allocation11 + $0x60] ss:$16 sps:$4 sm:$0xff]  }
 0x45c   :  { %3820 = vmatpush1.bf16.msra.mxu0 %v6188_v45  ;;  %v6265_v45 = vld [vmem:[#allocation11 + $0x80] ss:$16 sps:$4 sm:$0xff]  }
 0x45d   :  { %3821 = vmatprep.subr.bf16.mxu0 %v6193_v47  ;;  %v6266_v47 = vld [vmem:[#allocation11 + $0xa0] ss:$16 sps:$4 sm:$0xff]  }
 0x460   :  { %3822 = vmatpush1.bf16.msra.mxu0 %v6191_v50  ;;  %v6267_v50 = vld [vmem:[#allocation11 + $0xc0] ss:$16 sps:$4 sm:$0xff]  }
 0x461   :  { %3823 = vmatprep.subr.bf16.mxu0 %v6196_v51  ;;  %v6268_v51 = vld [vmem:[#allocation11 + $0xe0] ss:$16 sps:$4 sm:$0xff]  }
 0x464   :  { %3824 = vmatpush1.bf16.msra.mxu0 %v6194_v53  ;;  %v6269_v53 = vld [vmem:[#allocation11 + $0x4] ss:$16 sps:$4 sm:$0xff]  }
 0x465   :  { %5385 = vmatprep.subr.bf16.mxu0 %v6497_v20 }
 0x467   :  { %3826 = vmatmul.mubr.bf16.vlgmr.msra.gmra.mrb[8].mxu0 %v6724_v13  ;;  %v6252_v13 = vld [vmem:[#allocation10 + $0x50] ss:$12 sps:$4 sm:$0xff]  }
 0x468   :  { %5401 = vmatprep.mubr.msk.bf16.mxu0 %vm6498_vm1, %v6497_v20  ;;  %5386 = vmatpush3.bf16.msra.mxu0 %v6269_v53 }
 0x469   :  { %5387 = vmatprep.subr.bf16.mxu0 %v6497_v20 }
 0x46c   :  { %5388 = vmatpush3.bf16.msra.mxu0 %v6270_v54 }
 0x46d   :  { %5389 = vmatprep.subr.bf16.mxu0 %v6497_v20 }
 0x470   :  { %5390 = vmatpush3.bf16.msra.mxu0 %v6271_v38 }
 0x471   :  { %5391 = vmatprep.subr.bf16.mxu0 %v6497_v20 }
 0x474   :  { %5392 = vmatpush3.bf16.msra.mxu0 %v6272_v55  ;;  %v5298_v55 = vld [vmem:[#allocation13 + $0x18] ss:$0 sm:$0xff] }
 0x475   :  { %5393 = vmatprep.subr.bf16.mxu0 %v6497_v20 }
 0x478   :  { %5394 = vmatpush3.bf16.msra.mxu0 %v6273_v57 }
 0x479   :  { %5395 = vmatprep.subr.bf16.mxu0 %v6497_v20 }
 0x47c   :  { %5396 = vmatpush3.bf16.msra.mxu0 %v6274_v58 }
 0x47d   :  { %5397 = vmatprep.subr.bf16.mxu0 %v6497_v20 }
 0x53a   :  { %v3827_v63 = vpop.f32.mrb[8].mxu0 }
 0x53b   :  { %v5461_v42 = vadd.f32 %v3827_v63, %v3423_v61  ;;  %v3829_v0 = vpop.f32.mrb[9].mxu0 }
 0x53c   :  { %v5462_v1 = vadd.f32 %v3829_v0, %v3427_v62  ;;  %v3831_v2 = vpop.f32.mrb[10].mxu0 }
 0x53d   :  { %v5463_v3 = vadd.f32 %v3831_v2, %v3423_v61  ;;  %v3833_v46 = vpop.f32.mrb[11].mxu0  ;;  %v3836_v5 = vmax.f32 %v5461_v42, 0.0  ;;  %v5254_v61 = vld [vmem:[#allocation13 + $0x14] ss:$0 sm:$0xff] }
 0x53e   :  { %v5464_v4 = vadd.f32 %v3833_v46, %v3427_v62  ;;  %v3837_v49 = vmax.f32 %v5462_v1, 0.0 }
 0x53f   :  { %v3838_v6 = vmax.f32 %v5463_v3, 0.0 }
 0x540   :  { %v3839_v21 = vmax.f32 %v5464_v4, 0.0 }
 0x541   :  { %v3840_v7 = vpack.c.bf16 %v3838_v6, %v3836_v5  ;;  %v6275_v6 = vld [vmem:[#allocation11 + $0xc4] ss:$16 sps:$4 sm:$0xff]  }
 0x542   :  { %v3841_v8 = vpack.c.bf16 %v3839_v21, %v3837_v49  ;;  %5398 = vmatpush3.bf16.msra.mxu0 %v6275_v6  ;;  %v6276_v49 = vld [vmem:[#allocation11 + $0xe4] ss:$16 sps:$4 sm:$0xff]   ;;  %v6277_v21 = vld [vmem:[#allocation11 + $0x8] ss:$16 sps:$4 sm:$0xff]  }
 0x543   :  { %5399 = vmatprep.subr.bf16.mxu0 %v6497_v20 }
 0x544   :  { %4078 = vmatprep.mubr.bf16.mxu1 %v3841_v8  ;;  %v6279_v8 = vld [vmem:[#allocation11 + $0x48] ss:$16 sps:$4 sm:$0xff]  }
 0x545   :  { %4079 = vmatmul.mubr.bf16.vlgmr.msra.gmra.mrb[24].mxu1 %v3840_v7  ;;  %v6278_v7 = vld [vmem:[#allocation11 + $0x28] ss:$16 sps:$4 sm:$0xff]  }
 0x546   :  { %5308 = vmatpush3.bf16.msra.mxu1 %v6246_v9  ;;  %5400 = vmatpush3.bf16.msra.mxu0 %v6276_v49  ;;  %v6280_v9 = vld [vmem:[#allocation11 + $0x68] ss:$16 sps:$4 sm:$0xff]  }
 0x547   :  { %5309 = vmatprep.subr.bf16.mxu1 %v6247_v10  ;;  %5425 = vmatprep.subr.bf16.mxu0 %v6497_v20  ;;  %v6281_v10 = vld [vmem:[#allocation11 + $0x88] ss:$16 sps:$4 sm:$0xff]  }
 0x54a   :  { %5310 = vmatpush3.bf16.msra.mxu1 %v6248_v11  ;;  %v6282_v11 = vld [vmem:[#allocation11 + $0xa8] ss:$16 sps:$4 sm:$0xff]  }
 0x54b   :  { %5311 = vmatprep.subr.bf16.mxu1 %v6249_v52  ;;  %v5271_v52 = vld [vmem:[#allocation13 + $0x15] ss:$0 sm:$0xff] }
 0x54e   :  { %5312 = vmatpush3.bf16.msra.mxu1 %v6250_v48 }
 0x54f   :  { %5313 = vmatprep.subr.bf16.mxu1 %v6251_v12 }
 0x552   :  { %5314 = vmatpush3.bf16.msra.mxu1 %v6252_v13 }
 0x553   :  { %5315 = vmatprep.subr.bf16.mxu1 %v6253_v14 }
 0x556   :  { %5316 = vmatpush3.bf16.msra.mxu1 %v6254_v15 }
 0x557   :  { %5317 = vmatprep.subr.bf16.mxu1 %v6255_v16 }
 0x55a   :  { %5318 = vmatpush3.bf16.msra.mxu1 %v6256_v59 }
 0x55b   :  { %5319 = vmatprep.subr.bf16.mxu1 %v6257_v56 }
 0x55e   :  { %5320 = vmatpush3.bf16.msra.mxu1 %v6258_v17 }
 0x55f   :  { %5321 = vmatprep.subr.bf16.mxu1 %v6259_v18  ;;  %v6283_v18 = vld [vmem:[#allocation11 + $0xc8] ss:$16 sps:$4 sm:$0xff]  }
 0x562   :  { %5322 = vmatpush3.bf16.msra.mxu1 %v6260_v19  ;;  %v6284_v19 = vld [vmem:[#allocation11 + $0xe8] ss:$16 sps:$4 sm:$0xff]  }
 0x563   :  { %5365 = vmatprep.subr.bf16.mxu1 %v6497_v20 }
 0x618   :  { %v4080_v25 = vpop.f32.mrb[24].mxu1 }
 0x619   :  { %v4081_v26 = vadd.f32 %v4080_v25, %v3879_v23  ;;  %v4082_v27 = vpop.f32.mrb[25].mxu1  ;;  %v6288_v25 = vld [vmem:[#allocation11 + $0x6c] ss:$16 sps:$4 sm:$0xff]  }
 0x61a   :  { %v4083_v28 = vadd.f32 %v4082_v27, %v3883_v24  ;;  %v4084_v29 = vpop.f32.mrb[26].mxu1  ;;  %v6290_v27 = vld [vmem:[#allocation11 + $0xac] ss:$16 sps:$4 sm:$0xff]  }
 0x61b   :  { %v4085_v30 = vadd.f32 %v4084_v29, %v3879_v23  ;;  %v4086_v31 = vpop.f32.mrb[27].mxu1  ;;  %v4089_v33 = vmax.f32 %v4081_v26, 0.0  ;;  %v6286_v23 = vld [vmem:[#allocation11 + $0x2c] ss:$16 sps:$4 sm:$0xff]  }
 0x61c   :  { %v4087_v32 = vadd.f32 %v4086_v31, %v3883_v24  ;;  %v4090_v35 = vmax.f32 %v4083_v28, 0.0  ;;  %v6287_v24 = vld [vmem:[#allocation11 + $0x4c] ss:$16 sps:$4 sm:$0xff]   ;;  %v5280_v28 = vld [vmem:[#allocation13 + $0x16] ss:$0 sm:$0xff] }
 0x61d   :  { %v4091_v34 = vmax.f32 %v4085_v30, 0.0  ;;  %v6289_v26 = vld [vmem:[#allocation11 + $0x8c] ss:$16 sps:$4 sm:$0xff]  }
 0x61e   :  { %v4092_v36 = vmax.f32 %v4087_v32, 0.0 }
 0x61f   :  { %v4093_v41 = vpack.c.bf16 %v4091_v34, %v4089_v33 }
 0x620   :  { %v4094_v43 = vpack.c.bf16 %v4092_v36, %v4090_v35 }
 0x622   :  { %4262 = vmatprep.mubr.bf16.mxu1 %v4094_v43  ;;  %v6291_v43 = vld [vmem:[#allocation11 + $0xcc] ss:$16 sps:$4 sm:$0xff]  }
 0x623   :  { %4263 = vmatmul.mubr.bf16.vlgmr.msra.gmra.mrb[28].mxu1 %v4093_v41 }
 0x624   :  { %5366 = vmatpush3.bf16.msra.mxu1 %v6261_v44  ;;  %5381 = vmatprep.mubr.msk.bf16.mxu1 %vm6498_vm1, %v6497_v20  ;;  %v6292_v44 = vld [vmem:[#allocation11 + $0xec] ss:$16 sps:$4 sm:$0xff]  }
 0x625   :  { %5367 = vmatprep.subr.bf16.mxu1 %v6497_v20 }
 0x628   :  { %5368 = vmatpush3.bf16.msra.mxu1 %v6262_v39  ;;  %v5289_v39 = vld [vmem:[#allocation13 + $0x17] ss:$0 sm:$0xff] }
 0x629   :  { %5369 = vmatprep.subr.bf16.mxu1 %v6497_v20 }
 0x62c   :  { %5370 = vmatpush3.bf16.msra.mxu1 %v6263_v40 }
 0x62d   :  { %5371 = vmatprep.subr.bf16.mxu1 %v6497_v20 }
 0x630   :  { %5372 = vmatpush3.bf16.msra.mxu1 %v6264_v37 }
 0x631   :  { %5373 = vmatprep.subr.bf16.mxu1 %v6497_v20 }
 0x634   :  { %5374 = vmatpush3.bf16.msra.mxu1 %v6265_v45 }
 0x635   :  { %5375 = vmatprep.subr.bf16.mxu1 %v6497_v20 }
 0x638   :  { %5376 = vmatpush3.bf16.msra.mxu1 %v6266_v47 }
 0x639   :  { %5377 = vmatprep.subr.bf16.mxu1 %v6497_v20 }
 0x63c   :  { %5378 = vmatpush3.bf16.msra.mxu1 %v6267_v50 }
 0x63d   :  { %5379 = vmatprep.subr.bf16.mxu1 %v6497_v20 }
 0x640   :  { %5380 = vmatpush3.bf16.msra.mxu1 %v6268_v51 }
 0x641   :  { %5405 = vmatprep.subr.bf16.mxu1 %v6497_v20 }
 0x6f6   :  { %v5323_v60 = vpop.f32.mrb[28].mxu1 }
 0x6f7   :  { %v5324_v62 = vpop.f32.mrb[29].mxu1 }
 0x6f8   :  { %v5325_v63 = vadd.f32 %v5324_v62, %v5323_v60  ;;  %v5326_v42 = vpop.f32.mrb[30].mxu1 }
 0x6f9   :  { %v5327_v0 = vpop.f32.mrb[31].mxu1 }
 0x6fa   :  { %v4265_v1 = vadd.f32 %v5325_v63, %v5254_v61  ;;  %v5328_v2 = vadd.f32 %v5327_v0, %v5326_v42 }
 0x6fc   :  { %v4268_v3 = vadd.f32 %v5328_v2, %v5254_v61  ;;  %v4271_v46 = vmax.f32 %v4265_v1, 0.0 }
 0x6fe   :  { %v4272_v4 = vmax.f32 %v4268_v3, 0.0 }
 0x700   :  { %v4273_v5 = vpack.c.bf16 %v4272_v4, %v4271_v46 }
 0x702   :  { %5382 = vmatmul.mubr.bf16.vlgmr.msra.gmra.mrb[32].mxu1 %v4273_v5 }
 0x703   :  { %5421 = vmatprep.mubr.msk.bf16.mxu1 %vm6498_vm1, %v6497_v20  ;;  %5406 = vmatpush3.bf16.msra.mxu1 %v6277_v21 }
 0x704   :  { %5407 = vmatprep.subr.bf16.mxu1 %v6497_v20 }
 0x707   :  { %5408 = vmatpush3.bf16.msra.mxu1 %v6278_v7 }
 0x708   :  { %5409 = vmatprep.subr.bf16.mxu1 %v6497_v20 }
 0x70b   :  { %5410 = vmatpush3.bf16.msra.mxu1 %v6279_v8 }
 0x70c   :  { %5411 = vmatprep.subr.bf16.mxu1 %v6497_v20 }
 0x70f   :  { %5412 = vmatpush3.bf16.msra.mxu1 %v6280_v9 }
 0x710   :  { %5413 = vmatprep.subr.bf16.mxu1 %v6497_v20 }
 0x713   :  { %5414 = vmatpush3.bf16.msra.mxu1 %v6281_v10 }
 0x714   :  { %5415 = vmatprep.subr.bf16.mxu1 %v6497_v20 }
 0x717   :  { %5416 = vmatpush3.bf16.msra.mxu1 %v6282_v11 }
 0x718   :  { %5417 = vmatprep.subr.bf16.mxu1 %v6497_v20 }
 0x71b   :  { %5418 = vmatpush3.bf16.msra.mxu1 %v6283_v18 }
 0x71c   :  { %5419 = vmatprep.subr.bf16.mxu1 %v6497_v20 }
 0x71f   :  { %5420 = vmatpush3.bf16.msra.mxu1 %v6284_v19 }
 0x7d5   :  { %v4379_v48 = vpop.f32.mrb[32].mxu1 }
 0x7d6   :  { %v4380_v12 = vadd.f32 %v5271_v52, %v4379_v48  ;;  %v5383_v13 = vpop.f32.mrb[33].mxu1 }
 0x7d7   :  { %v4382_v14 = vpop.f32.mrb[34].mxu1 }
 0x7d8   :  { %v4383_v15 = vadd.f32 %v5271_v52, %v4382_v14  ;;  %v5384_v16 = vpop.f32.mrb[35].mxu1  ;;  %v4386_v59 = vmax.f32 %v4380_v12, 0.0 }
 0x7da   :  { %v4387_v56 = vmax.f32 %v4383_v15, 0.0 }
 0x7dc   :  { %v4388_v17 = vpack.c.bf16 %v4387_v56, %v4386_v59 }
 0x7de   :  { %5402 = vmatmul.mubr.bf16.vlgmr.msra.gmra.mrb[12].mxu0 %v4388_v17 }
 0x7df   :  { %5441 = vmatprep.mubr.msk.bf16.mxu0 %vm6498_vm1, %v6497_v20  ;;  %5426 = vmatpush3.bf16.msra.mxu0 %v6285_v22 }
 0x7e0   :  { %5427 = vmatprep.subr.bf16.mxu0 %v6497_v20 }
 0x7e3   :  { %5428 = vmatpush3.bf16.msra.mxu0 %v6286_v23 }
 0x7e4   :  { %5429 = vmatprep.subr.bf16.mxu0 %v6497_v20 }
 0x7e7   :  { %5430 = vmatpush3.bf16.msra.mxu0 %v6287_v24 }
 0x7e8   :  { %5431 = vmatprep.subr.bf16.mxu0 %v6497_v20 }
 0x7eb   :  { %5432 = vmatpush3.bf16.msra.mxu0 %v6288_v25 }
 0x7ec   :  { %5433 = vmatprep.subr.bf16.mxu0 %v6497_v20 }
 0x7ef   :  { %5434 = vmatpush3.bf16.msra.mxu0 %v6289_v26 }
 0x7f0   :  { %5435 = vmatprep.subr.bf16.mxu0 %v6497_v20 }
 0x7f3   :  { %5436 = vmatpush3.bf16.msra.mxu0 %v6290_v27 }
 0x7f4   :  { %5437 = vmatprep.subr.bf16.mxu0 %v6497_v20 }
 0x7f7   :  { %5438 = vmatpush3.bf16.msra.mxu0 %v6291_v43 }
 0x7f8   :  { %5439 = vmatprep.subr.bf16.mxu0 %v6497_v20 }
 0x7fb   :  { %5440 = vmatpush3.bf16.msra.mxu0 %v6292_v44 }
 0x8b1   :  { %v4494_v29 = vpop.f32.mrb[12].mxu0 }
 0x8b2   :  { %v4495_v30 = vadd.f32 %v5280_v28, %v4494_v29  ;;  %v5403_v31 = vpop.f32.mrb[13].mxu0 }
 0x8b3   :  { %v4497_v32 = vpop.f32.mrb[14].mxu0 }
 0x8b4   :  { %v4498_v33 = vadd.f32 %v5280_v28, %v4497_v32  ;;  %v5404_v34 = vpop.f32.mrb[15].mxu0  ;;  %v4501_v35 = vmax.f32 %v4495_v30, 0.0 }
 0x8b6   :  { %v4502_v36 = vmax.f32 %v4498_v33, 0.0 }
 0x8b8   :  { %v4503_v41 = vpack.c.bf16 %v4502_v36, %v4501_v35 }
 0x8ba   :  { %5422 = vmatmul.mubr.bf16.vlgmr.msra.gmra.mrb[36].mxu1 %v4503_v41 }
 0x98d   :  { %v4609_v40 = vpop.f32.mrb[36].mxu1 }
 0x98e   :  { %v4610_v37 = vadd.f32 %v5289_v39, %v4609_v40  ;;  %v5423_v45 = vpop.f32.mrb[37].mxu1 }
 0x98f   :  { %v4612_v47 = vpop.f32.mrb[38].mxu1 }
 0x990   :  { %v4613_v50 = vadd.f32 %v5289_v39, %v4612_v47  ;;  %v5424_v51 = vpop.f32.mrb[39].mxu1  ;;  %v4616_v53 = vmax.f32 %v4610_v37, 0.0 }
 0x992   :  { %v4617_v54 = vmax.f32 %v4613_v50, 0.0 }
 0x994   :  { %v4618_v38 = vpack.c.bf16 %v4617_v54, %v4616_v53 }
 0x996   :  { %5442 = vmatmul.mubr.bf16.vlgmr.msra.gmra.mrb[16].mxu0 %v4618_v38 }
 0xa69   :  { %v4724_v57 = vpop.f32.mrb[16].mxu0 }
 0xa6a   :  { %v4725_v58 = vadd.f32 %v5298_v55, %v4724_v57  ;;  %v5443_v60 = vpop.f32.mrb[17].mxu0 }
 0xa6b   :  { %v4727_v20 = vpop.f32.mrb[18].mxu0 }
 0xa6c   :  { %4731 = vst [vmem:[#allocation14] sm:$0xff] %v4725_v58  ;;  %v4728_v61 = vadd.f32 %v5298_v55, %v4727_v20  ;;  %v5444_v62 = vpop.f32.mrb[19].mxu0 }
 0xa6e   :  { %4732 = vst [vmem:[#allocation14 + $0x8] sm:$0xff] %v4728_v61 }
 0xa6f   :  { %6458 = shalt.err (!%p6455_p4)
}
 0xa70   :  { %s6459_s21 = scalar_lea.hbm %s6790_s7, 256 }
 0xa71   :  { %p6460_p5 = scmp.ne.s32.totalorder %s6790_s7, %s6459_s21  ;;  %p6463_p6 = scmp.lt.u32.totalorder %s6459_s21, %s6790_s7 }
 0xa73   :  { %p6465_p7 = pnand %p6463_p6, %p6460_p5 }
 0xa75   :  { %6468 = shalt.err (!%p6465_p7)
}
 0xa76   :  { %s6500_s25 = smov 128   ;;  %s6501_s26 = smov 8  }
 0xa77   :  { %4744 = dma.vmem_to_hbm [thread:$0]  %s4739_s19, 256, %s6790_s7, [#allocation4], %s6500_s25, %s6500_s25, %s6501_s26  }
 0xa78   :  { %6477 = dma.done.wait [#allocation4], 256  }
 0xa79   :  { %6478 = vsyncadd [#allocation4], 4294967040 }
 0xa7a   :  { %4748 = vsyncpa [#allocation3], 1 }
 0xa7b   :  { %4749 = vsyncpa [#allocation6], 1 }
 0xa7c   :  { %4750 = vsyncpa [#allocation9], 1 }
 0xa7d   :  { %4751 = vsyncpa [#allocation12], 1 }
 0xa7e   :  { %4752 = vsyncpa [#allocation4], 1 }

</bundles_post_ra>
